<compile_context>
chip_gen: v7x
topology: tpu7x:2x2x1
jax: 0.10.0
libtpu: 0.0.40
codegen_flags: <defaults>
</compile_context>

<pallas_src>
import functools

import jax
import jax.numpy as jnp
from jax.experimental import pallas as pl
from jax.experimental.pallas import tpu as pltpu


# --------------------------------------------------------------------------
# hardware-derived tuning helpers
# --------------------------------------------------------------------------
def _vmem_capacity_bytes():
    try:
        return int(pltpu.get_tpu_info().vmem_capacity_bytes)
    except Exception:
        return 64 * 1024 * 1024            # conservative (v7x per-TC budget)


def _has_bf16_vector_units():
    # bf16 VPU/EUP exists on v6e / v7x; v5e and older would just upconvert.
    try:
        kind = jax.devices()[0].device_kind.lower()
    except Exception:
        return True
    return not any(tag in kind for tag in ("v2", "v3", "v4", "v5"))


def _pick_tq(n_pad, tq_req, stripe_budget):
    """Largest 128-multiple divisor of n_pad that is <= tq_req and whose
    (tq, N) stripe temporaries fit the VMEM budget (falls back to 128)."""
    tq_req = max(128, (int(tq_req) // 128) * 128)
    best = 128
    for cand in range(128, min(tq_req, n_pad) + 1, 128):
        if n_pad % cand == 0 and 16 * cand * n_pad <= stripe_budget:
            best = cand
    return best


def _vmem_limit_bytes(C, C4, n_pad, tq, cap):
    f32, bf16 = 4, 2
    per_buf = (2 * C * n_pad * f32                 # resident x block + out block
               + n_pad * f32                       # ol block
               + (C4 + 2 * C + 1) * C * bf16       # stacked weights
               + (C + 1) * 4 * f32)                # packed per-channel params
    windows = 2 * per_buf                          # BlockSpec double buffering
    scratch = C4 * n_pad * bf16 + (-(-(C + 1) // 8) * 8) * n_pad * f32
    stripe = 16 * tq * n_pad                       # att / e / select temporaries
    est = windows + scratch + stripe
    # Explicit and generous: never rely on the 16/32 MiB default scoped limit.
    return min(int(0.9 * cap), max(2 * est, 48 * 1024 * 1024))


# --------------------------------------------------------------------------
# kernel
# --------------------------------------------------------------------------
def overlap_attention_kernel(x_ref, ol_ref, w_ref, p_ref, o_ref,
                             qf_ref, acc_ref, *, groups, n_valid, bf16_exp):
    ki = pl.program_id(1)
    n_i = pl.num_programs(1)

    C = x_ref.shape[1]
    N = x_ref.shape[2]
    C4 = w_ref.shape[0] - 2 * C - 1       # stacked weights: [w_qk; w_t; w_v_aug]
    tq = N // n_i
    padded = n_valid != N                 # static python bool

    # ---- once per batch: full q (Gram RHS) in bf16 + zeroed accumulator ----
    @pl.when(ki == 0)
    def _():
        x_bf = x_ref[0].astype(jnp.bfloat16)                       # (C, N)
        wqk = w_ref[0:C4, :]                                       # (C4, C)
        qf_ref[...] = jnp.dot(wqk, x_bf,
                              preferred_element_type=jnp.float32
                              ).astype(jnp.bfloat16)               # (C4, N)
        acc_ref[...] = jnp.zeros_like(acc_ref)

    off = pl.multiple_of(ki * tq, 128)

    # q for this row tile comes straight from scratch (no per-tile reprojection)
    q_t = qf_ref[:, pl.ds(off, tq)]                                # (C4, tq) bf16
    olt = ol_ref[0, :, pl.ds(off, tq)]                             # (1, tq)  f32
    ql_t = (q_t * olt).astype(jnp.bfloat16)                        # fold ol row-scale

    # value projection for this row tile only; the augmented weight carries a
    # zero row + unit bias so x_v1's last row is exactly 1.0 (colsum fusion).
    xt = x_ref[0, :, pl.ds(off, tq)].astype(jnp.bfloat16)          # (C, tq)
    wv_aug = w_ref[C4 + C:, :]                                     # (C+1, C) bf16
    x_v1 = jnp.dot(wv_aug, xt, preferred_element_type=jnp.float32) \
        + p_ref[:, 0:1]                                            # (C+1, tq)

    # ---- attention row stripe: att[i, j] for i in this tile, all keys j ----
    # NOTE: both Gram operands are bf16 (f32 accumulate), so att carries bf16
    # rounding and is not exactly symmetric (fine at the stated tolerance).
    att = jax.lax.dot_general(ql_t, qf_ref[...], (((0,), (0,)), ((), ())),
                              preferred_element_type=jnp.float32)  # (tq, N)
    if padded:                                                     # mask pad keys
        col = jax.lax.broadcasted_iota(jnp.int32, (1, N), 1)
        att = jnp.where(col < n_valid, att, jnp.float32(-1e30))

    m = jnp.max(att, axis=-1, keepdims=True)                       # (tq, 1)
    shifted = att - m
    if bf16_exp:
        e = jnp.exp(shifted.astype(jnp.bfloat16))      # bf16 EUP path (v6e/v7x)
    else:
        e = jnp.exp(shifted)                           # f32 path (v5e & older)
    row_sum = jnp.sum(e, axis=-1, keepdims=True, dtype=jnp.float32)
    r_row = (1.0 / row_sum).reshape(1, tq)             # exact; tiny transpose
    if padded:                                         # mask padded query rows
        qidx = off + jax.lax.broadcasted_iota(jnp.int32, (1, tq), 1)
        r_row = jnp.where(qidx < n_valid, r_row, 0.0)

    # Softmax row scale folded into the small left operand; its last row is r,
    # so one MXU call accumulates both x_v @ softmax and the column sums.
    left = (x_v1 * r_row).astype(jnp.bfloat16)                     # (C+1, tq)
    e_bf = e if e.dtype == jnp.bfloat16 else e.astype(jnp.bfloat16)
    acc_ref[...] += jnp.dot(left, e_bf, preferred_element_type=jnp.float32)

    # ---- last row tile: column renorm, trans conv, GroupNorm, ReLU, skip ---
    # TODO(synk): for very large N split this O(C*N) epilogue into a
    # column-tiled pass (or second pallas_call) so it overlaps the next batch.
    @pl.when(ki == n_i - 1)
    def _():
        x = x_ref[0].astype(jnp.float32)                           # (C, N)
        acc = acc_ref[...]                                         # (C+1, N)
        x_r = acc[:C] * (1.0 / (1e-9 + acc[C:C + 1]))              # exact renorm

        wt = w_ref[C4:C4 + C, :]                                   # (C, C) bf16
        d = (x - x_r).astype(jnp.bfloat16)
        t = jnp.dot(wt, d, preferred_element_type=jnp.float32) + p_ref[0:C, 1:2]

        # GroupNorm(groups, C), eps=1e-5: two-pass stats + rsqrt on the EUP.
        cg = C // groups
        inv_cnt = 1.0 / (cg * n_valid)
        if padded:
            col = jax.lax.broadcasted_iota(jnp.int32, (1, N), 1)
            valid = col < n_valid
            t = jnp.where(valid, t, 0.0)
        tg = t.reshape(groups, cg, N)
        mean = jnp.sum(jnp.sum(tg, axis=2, keepdims=True), axis=1,
                       keepdims=True) * inv_cnt
        cen = tg - mean
        if padded:
            cen = jnp.where(valid.reshape(1, 1, N), cen, 0.0)
        var = jnp.sum(jnp.sum(cen * cen, axis=2, keepdims=True), axis=1,
                      keepdims=True) * inv_cnt
        rstd = jax.lax.rsqrt(var + 1e-5)
        tn = (cen * rstd).reshape(C, N)
        tn = tn * p_ref[0:C, 2:3] + p_ref[0:C, 3:4]                # affine

        o_ref[0] = (x + jnp.maximum(tn, 0.0)).astype(o_ref.dtype)


# --------------------------------------------------------------------------
# wrapper
# --------------------------------------------------------------------------
def overlap_attention_block(x, ol_score, params, *, groups, tq=512,
                            vmem_limit_bytes=None, bf16_exp=None):
    B, C, N = x.shape
    C4 = params["w_qk"].shape[0]

    if bf16_exp is None:
        bf16_exp = _has_bf16_vector_units()

    # Pad the point dim to a lane multiple; the kernel masks padded keys /
    # queries and the wrapper slices the result back (no tq=N fallback).
    n_pad = -(-N // 128) * 128
    if n_pad != N:
        x_in = jnp.pad(x, ((0, 0), (0, 0), (0, n_pad - N)))
        ol_in = jnp.pad(ol_score, ((0, 0), (0, n_pad - N)))
    else:
        x_in, ol_in = x, ol_score

    cap = _vmem_capacity_bytes()
    tq = _pick_tq(n_pad, tq, int(0.35 * cap))
    n_i = n_pad // tq

    ol3 = ol_in.reshape(B, 1, n_pad).astype(jnp.float32)

    # Stacked bf16 weights: [w_qk (C4); w_t (C); w_v_aug (C+1)].  The extra
    # zero row of w_v_aug + unit bias make the value projection's last row a
    # constant 1 -> softmax column sums come out of the same MXU call.
    f32 = jnp.float32
    wv_aug = jnp.concatenate(
        [params["w_v"].astype(f32), jnp.zeros((1, C), f32)], axis=0)
    w_all = jnp.concatenate(
        [params["w_qk"].astype(f32), params["w_t"].astype(f32), wv_aug],
        axis=0).astype(jnp.bfloat16)                      # (C4 + 2C + 1, C)

    pad1 = jnp.zeros((1, 1), f32)
    p_all = jnp.concatenate([
        jnp.concatenate([params["b_v"].astype(f32), jnp.ones((1, 1), f32)], 0),
        jnp.concatenate([params["b_t"].astype(f32), pad1], 0),
        jnp.concatenate([params["gamma"].astype(f32), pad1], 0),
        jnp.concatenate([params["beta"].astype(f32), pad1], 0),
    ], axis=1)                                            # (C + 1, 4)

    if vmem_limit_bytes is None:
        vmem_limit_bytes = _vmem_limit_bytes(C, C4, n_pad, tq, cap)

    kernel = functools.partial(overlap_attention_kernel, groups=groups,
                               n_valid=N, bf16_exp=bool(bf16_exp))
    out = pl.pallas_call(
        kernel,
        out_shape=jax.ShapeDtypeStruct((B, C, n_pad), x.dtype),
        grid_spec=pltpu.PrefetchScalarGridSpec(
            num_scalar_prefetch=0,
            grid=(B, n_i),
            in_specs=[
                pl.BlockSpec((1, C, n_pad), lambda b, i: (b, 0, 0)),   # x (resident)
                pl.BlockSpec((1, 1, n_pad), lambda b, i: (b, 0, 0)),   # ol (resident)
                pl.BlockSpec((C4 + 2 * C + 1, C), lambda b, i: (0, 0)),  # weights
                pl.BlockSpec((C + 1, 4), lambda b, i: (0, 0)),           # b_v/b_t/γ/β
            ],
            out_specs=pl.BlockSpec((1, C, n_pad), lambda b, i: (b, 0, 0)),
            scratch_shapes=[
                pltpu.VMEM((C4, n_pad), jnp.bfloat16),     # q over all points
                pltpu.VMEM((C + 1, n_pad), jnp.float32),   # [x_v @ softmax ; colsum]
            ],
        ),
        compiler_params=pltpu.CompilerParams(
            dimension_semantics=("parallel", "arbitrary"),
            vmem_limit_bytes=vmem_limit_bytes),
    )(x_in, ol3, w_all, p_all)

    if n_pad != N:
        out = out[:, :, :N]
    return out


# --------------------------------------------------------------------------
# pure-JAX reference (f32 mirror of the PyTorch forward)
# --------------------------------------------------------------------------
def reference(x, ol, p, *, groups):
    B, C, N = x.shape
    q = jnp.einsum("oc,bcn->bon", p["w_qk"], x)
    x_v = jnp.einsum("oc,bcn->bon", p["w_v"], x) + p["b_v"][None]
    att = jnp.einsum("bkn,bkm->bnm", q, q)          # bmm(q^T, k)
    att = ol[:, :, None] * att
    att = jax.nn.softmax(att, axis=-1)
    att = att / (1e-9 + att.sum(axis=1, keepdims=True))
    x_r = jnp.einsum("bcn,bnm->bcm", x_v, att)
    d = x - x_r
    t = jnp.einsum("oc,bcn->bon", p["w_t"], d) + p["b_t"][None]
    cg = C // groups
    tg = t.reshape(B, groups, cg, N)
    mean = tg.mean(axis=(2, 3), keepdims=True)
    var = ((tg - mean) ** 2).mean(axis=(2, 3), keepdims=True)
    tn = ((tg - mean) / jnp.sqrt(var + 1e-5)).reshape(B, C, N)
    tn = tn * p["gamma"][None] + p["beta"][None]
    return x + jnp.maximum(tn, 0.0)


if __name__ == "__main__":
    # channels must be a multiple of 32 (GroupNorm(channels // 32, channels))
    B, C, N = 2, 64, 256
    groups = C // 32

    key = jax.random.PRNGKey(0)
    ks = jax.random.split(key, 7)
    x = jax.random.normal(ks[0], (B, C, N), jnp.float32)
    ol_score = jax.random.uniform(ks[1], (B, N), jnp.float32)

    params = dict(
        w_qk=jax.random.normal(ks[2], (C // 4, C), jnp.float32) * 0.1,
        w_v=jax.random.normal(ks[3], (C, C), jnp.float32) * 0.1,
        b_v=jax.random.normal(ks[4], (C, 1), jnp.float32) * 0.1,
        w_t=jax.random.normal(ks[5], (C, C), jnp.float32) * 0.1,
        b_t=jax.random.normal(ks[6], (C, 1), jnp.float32) * 0.1,
        gamma=jnp.ones((C, 1), jnp.float32),   # GroupNorm default init
        beta=jnp.zeros((C, 1), jnp.float32),
    )

    # multi-tile init / accumulate / finalize path (N divisible by 128)
    out = overlap_attention_block(x, ol_score, params, groups=groups, tq=128)
    out = jax.block_until_ready(out)
    ref = reference(x, ol_score, params, groups=groups)
    assert out.shape == (B, C, N)
    assert bool(jnp.all(jnp.isfinite(out)))
    # bf16 MXU operands (+ bf16 exp on v6e/v7x) => allow ~1e-2-level drift
    assert bool(jnp.allclose(out, ref, atol=1e-1, rtol=5e-2))

    # padded + multi-tile path (N not a multiple of 128: pad + mask, no
    # silent tq=N fallback)
    N2 = 300
    x2 = jax.random.normal(jax.random.PRNGKey(1), (B, C, N2), jnp.float32)
    ol2 = jax.random.uniform(jax.random.PRNGKey(2), (B, N2), jnp.float32)
    out2 = jax.block_until_ready(
        overlap_attention_block(x2, ol2, params, groups=groups, tq=128))
    ref2 = reference(x2, ol2, params, groups=groups)
    assert out2.shape == (B, C, N2)
    assert bool(jnp.all(jnp.isfinite(out2)))
    assert bool(jnp.allclose(out2, ref2, atol=1e-1, rtol=5e-2))

    print("KERNEL_OK")
</pallas_src>

<mosaic_0001>
module attributes {stable_mosaic.version = 11 : i64} {
  func.func @overlap_attention_kernel(%arg0: i32, %arg1: i32, %arg2: memref<1x64x256xf32, #tpu.memory_space<vmem>>, %arg3: memref<1x1x256xf32, #tpu.memory_space<vmem>>, %arg4: memref<145x64xbf16, #tpu.memory_space<vmem>>, %arg5: memref<65x4xf32, #tpu.memory_space<vmem>>, %arg6: memref<1x64x256xf32, #tpu.memory_space<vmem>>, %arg7: memref<16x256xbf16, #tpu.memory_space<vmem>>, %arg8: memref<65x256xf32, #tpu.memory_space<vmem>>) attributes {dimension_semantics = [#tpu.dimension_semantics<parallel>, #tpu.dimension_semantics<arbitrary>], iteration_bounds = array<i64: 2, 2>, scalar_prefetch = 0 : i64, scratch_operands = 2 : i64, tpu.core_type = #tpu.core_type<tc>, window_params = [{transform_indices = @transform_0, window_bounds = array<i64: 1, 64, 256>}, {transform_indices = @transform_1, window_bounds = array<i64: 1, 1, 256>}, {pipeline_mode = #tpu.pipeline_mode<synchronous>, transform_indices = @transform_2, window_bounds = array<i64: 145, 64>}, {pipeline_mode = #tpu.pipeline_mode<synchronous>, transform_indices = @transform_3, window_bounds = array<i64: 65, 4>}, {transform_indices = @transform_4, window_bounds = array<i64: 1, 64, 256>}]} {
    %c0_i32 = arith.constant 0 : i32
    %0 = arith.cmpi eq, %arg1, %c0_i32 : i32
    %1 = arith.extui %0 : i1 to i32
    %c0_i32_0 = arith.constant 0 : i32
    %2 = arith.cmpi ne, %1, %c0_i32_0 : i32
    scf.if %2 {
      %c0_20 = arith.constant 0 : index
      %c0_21 = arith.constant 0 : index
      %c0_22 = arith.constant 0 : index
      %47 = vector.load %arg2[%c0_20, %c0_21, %c0_22] : memref<1x64x256xf32, #tpu.memory_space<vmem>>, vector<1x64x256xf32>
      %48 = vector.shape_cast %47 : vector<1x64x256xf32> to vector<64x256xf32>
      %49 = arith.truncf %48 : vector<64x256xf32> to vector<64x256xbf16>
      %c0_23 = arith.constant 0 : index
      %c0_24 = arith.constant 0 : index
      %50 = vector.load %arg4[%c0_23, %c0_24] : memref<145x64xbf16, #tpu.memory_space<vmem>>, vector<16x64xbf16>
      %cst_25 = arith.constant dense<0.000000e+00> : vector<16x256xf32>
      %51 = tpu.matmul %50, %49, %cst_25 {dimension_numbers = #tpu.dot_dimension_numbers<[1], [0], [0], [1], [0, 0, 1, 1], [], []>} : vector<16x64xbf16>, vector<64x256xbf16>, vector<16x256xf32> -> vector<16x256xf32>
      %52 = arith.truncf %51 : vector<16x256xf32> to vector<16x256xbf16>
      %c0_26 = arith.constant 0 : index
      %c0_27 = arith.constant 0 : index
      %53 = vector.load %arg7[%c0_26, %c0_27] : memref<16x256xbf16, #tpu.memory_space<vmem>>, vector<16x256xbf16>
      tpu.vector_store %arg7[%c0_26, %c0_27], %52 {strides = array<i32>} : memref<16x256xbf16, #tpu.memory_space<vmem>>, vector<16x256xbf16>,
      %cst_28 = arith.constant 0.000000e+00 : f32
      %54 = vector.broadcast %cst_28 : f32 to vector<65x256xf32>
      %c0_29 = arith.constant 0 : index
      %c0_30 = arith.constant 0 : index
      %55 = vector.load %arg8[%c0_29, %c0_30] : memref<65x256xf32, #tpu.memory_space<vmem>>, vector<65x256xf32>
      tpu.vector_store %arg8[%c0_29, %c0_30], %54 {strides = array<i32>} : memref<65x256xf32, #tpu.memory_space<vmem>>, vector<65x256xf32>,
    } else {
    }
    %c128_i32 = arith.constant 128 : i32
    %3 = arith.muli %arg1, %c128_i32 : i32
    %4 = tpu.assume_multiple %3, 128 : i32
    %c0 = arith.constant 0 : index
    %5 = arith.index_cast %4 : i32 to index
    %6 = vector.load %arg7[%c0, %5] : memref<16x256xbf16, #tpu.memory_space<vmem>>, vector<16x128xbf16>
    %c0_1 = arith.constant 0 : index
    %c0_2 = arith.constant 0 : index
    %7 = arith.index_cast %4 : i32 to index
    %8 = vector.load %arg3[%c0_1, %c0_2, %7] : memref<1x1x256xf32, #tpu.memory_space<vmem>>, vector<1x1x128xf32>
    %9 = vector.shape_cast %8 : vector<1x1x128xf32> to vector<1x128xf32>
    %10 = arith.extf %6 : vector<16x128xbf16> to vector<16x128xf32>
    %11 = vector.broadcast %9 : vector<1x128xf32> to vector<16x128xf32>
    %12 = arith.mulf %10, %11 : vector<16x128xf32>
    %13 = arith.truncf %12 : vector<16x128xf32> to vector<16x128xbf16>
    %c0_3 = arith.constant 0 : index
    %c0_4 = arith.constant 0 : index
    %14 = arith.index_cast %4 : i32 to index
    %15 = vector.load %arg2[%c0_3, %c0_4, %14] : memref<1x64x256xf32, #tpu.memory_space<vmem>>, vector<1x64x128xf32>
    %16 = vector.shape_cast %15 : vector<1x64x128xf32> to vector<64x128xf32>
    %17 = arith.truncf %16 : vector<64x128xf32> to vector<64x128xbf16>
    %c80 = arith.constant 80 : index
    %c0_5 = arith.constant 0 : index
    %18 = vector.load %arg4[%c80, %c0_5] : memref<145x64xbf16, #tpu.memory_space<vmem>>, vector<65x64xbf16>
    %cst = arith.constant dense<0.000000e+00> : vector<65x128xf32>
    %19 = tpu.matmul %18, %17, %cst {dimension_numbers = #tpu.dot_dimension_numbers<[1], [0], [0], [1], [0, 0, 1, 1], [], []>} : vector<65x64xbf16>, vector<64x128xbf16>, vector<65x128xf32> -> vector<65x128xf32>
    %c0_6 = arith.constant 0 : index
    %c0_7 = arith.constant 0 : index
    %20 = vector.load %arg5[%c0_6, %c0_7] : memref<65x4xf32, #tpu.memory_space<vmem>>, vector<65x1xf32>
    %21 = vector.broadcast %20 : vector<65x1xf32> to vector<65x128xf32>
    %22 = arith.addf %19, %21 : vector<65x128xf32>
    %c0_8 = arith.constant 0 : index
    %c0_9 = arith.constant 0 : index
    %23 = vector.load %arg7[%c0_8, %c0_9] : memref<16x256xbf16, #tpu.memory_space<vmem>>, vector<16x256xbf16>
    %cst_10 = arith.constant dense<0.000000e+00> : vector<128x256xf32>
    %24 = tpu.matmul %13, %23, %cst_10 {dimension_numbers = #tpu.dot_dimension_numbers<[0], [0], [1], [1], [0, 1, 1, 1], [], []>} : vector<16x128xbf16>, vector<16x256xbf16>, vector<128x256xf32> -> vector<128x256xf32>
    %cst_11 = arith.constant dense<0xFF800000> : vector<128xf32>
    %25 = vector.multi_reduction <maximumf>, %24, %cst_11 [1] : vector<128x256xf32> to vector<128xf32>
    %26 = vector.shape_cast %25 : vector<128xf32> to vector<128x1xf32>
    %27 = vector.broadcast %26 : vector<128x1xf32> to vector<128x256xf32>
    %28 = arith.subf %24, %27 : vector<128x256xf32>
    %29 = arith.truncf %28 : vector<128x256xf32> to vector<128x256xbf16>
    %30 = math.exp %29 : vector<128x256xbf16>
    %31 = arith.extf %30 : vector<128x256xbf16> to vector<128x256xf32>
    %cst_12 = arith.constant dense<0.000000e+00> : vector<128xf32>
    %32 = vector.multi_reduction <add>, %31, %cst_12 [1] : vector<128x256xf32> to vector<128xf32>
    %33 = vector.shape_cast %32 : vector<128xf32> to vector<128x1xf32>
    %cst_13 = arith.constant 1.000000e+00 : f32
    %34 = vector.broadcast %cst_13 : f32 to vector<128x1xf32>
    %35 = arith.divf %34, %33 : vector<128x1xf32>
    %36 = vector.shape_cast %35 : vector<128x1xf32> to vector<1x128xf32>
    %37 = vector.broadcast %36 : vector<1x128xf32> to vector<65x128xf32>
    %38 = arith.mulf %22, %37 : vector<65x128xf32>
    %39 = arith.truncf %38 : vector<65x128xf32> to vector<65x128xbf16>
    %c0_14 = arith.constant 0 : index
    %c0_15 = arith.constant 0 : index
    %40 = vector.load %arg8[%c0_14, %c0_15] : memref<65x256xf32, #tpu.memory_space<vmem>>, vector<65x256xf32>
    %cst_16 = arith.constant dense<0.000000e+00> : vector<65x256xf32>
    %41 = tpu.matmul %39, %30, %cst_16 {dimension_numbers = #tpu.dot_dimension_numbers<[1], [0], [0], [1], [0, 0, 1, 1], [], []>} : vector<65x128xbf16>, vector<128x256xbf16>, vector<65x256xf32> -> vector<65x256xf32>
    %42 = arith.addf %40, %41 : vector<65x256xf32>
    %c0_17 = arith.constant 0 : index
    %c0_18 = arith.constant 0 : index
    %43 = vector.load %arg8[%c0_17, %c0_18] : memref<65x256xf32, #tpu.memory_space<vmem>>, vector<65x256xf32>
    tpu.vector_store %arg8[%c0_17, %c0_18], %42 {strides = array<i32>} : memref<65x256xf32, #tpu.memory_space<vmem>>, vector<65x256xf32>,
    %c1_i32 = arith.constant 1 : i32
    %44 = arith.cmpi eq, %arg1, %c1_i32 : i32
    %45 = arith.extui %44 : i1 to i32
    %c0_i32_19 = arith.constant 0 : i32
    %46 = arith.cmpi ne, %45, %c0_i32_19 : i32
    scf.if %46 {
      %c0_20 = arith.constant 0 : index
      %c0_21 = arith.constant 0 : index
      %c0_22 = arith.constant 0 : index
      %47 = vector.load %arg2[%c0_20, %c0_21, %c0_22] : memref<1x64x256xf32, #tpu.memory_space<vmem>>, vector<1x64x256xf32>
      %48 = vector.shape_cast %47 : vector<1x64x256xf32> to vector<64x256xf32>
      %c0_23 = arith.constant 0 : index
      %c0_24 = arith.constant 0 : index
      %49 = vector.load %arg8[%c0_23, %c0_24] : memref<65x256xf32, #tpu.memory_space<vmem>>, vector<65x256xf32>
      %50 = vector.extract_strided_slice %49 {offsets = [0, 0], sizes = [64, 256], strides = [1, 1]} : vector<65x256xf32> to vector<64x256xf32>
      %51 = vector.extract_strided_slice %49 {offsets = [64, 0], sizes = [1, 256], strides = [1, 1]} : vector<65x256xf32> to vector<1x256xf32>
      %cst_25 = arith.constant 9.99999971E-10 : f32
      %52 = vector.broadcast %cst_25 : f32 to vector<1x256xf32>
      %53 = arith.addf %52, %51 : vector<1x256xf32>
      %cst_26 = arith.constant 1.000000e+00 : f32
      %54 = vector.broadcast %cst_26 : f32 to vector<1x256xf32>
      %55 = arith.divf %54, %53 : vector<1x256xf32>
      %56 = vector.broadcast %55 : vector<1x256xf32> to vector<64x256xf32>
      %57 = arith.mulf %50, %56 : vector<64x256xf32>
      %c16 = arith.constant 16 : index
      %c0_27 = arith.constant 0 : index
      %58 = vector.load %arg4[%c16, %c0_27] : memref<145x64xbf16, #tpu.memory_space<vmem>>, vector<64x64xbf16>
      %59 = arith.subf %48, %57 : vector<64x256xf32>
      %60 = arith.truncf %59 : vector<64x256xf32> to vector<64x256xbf16>
      %cst_28 = arith.constant dense<0.000000e+00> : vector<64x256xf32>
      %61 = tpu.matmul %58, %60, %cst_28 {dimension_numbers = #tpu.dot_dimension_numbers<[1], [0], [0], [1], [0, 0, 1, 1], [], []>} : vector<64x64xbf16>, vector<64x256xbf16>, vector<64x256xf32> -> vector<64x256xf32>
      %c0_29 = arith.constant 0 : index
      %c1 = arith.constant 1 : index
      %62 = vector.load %arg5[%c0_29, %c1] : memref<65x4xf32, #tpu.memory_space<vmem>>, vector<64x1xf32>
      %63 = vector.broadcast %62 : vector<64x1xf32> to vector<64x256xf32>
      %64 = arith.addf %61, %63 : vector<64x256xf32>
      %65 = vector.shape_cast %64 : vector<64x256xf32> to vector<2x32x256xf32>
      %cst_30 = arith.constant dense<0.000000e+00> : vector<2x32xf32>
      %66 = vector.multi_reduction <add>, %65, %cst_30 [2] : vector<2x32x256xf32> to vector<2x32xf32>
      %67 = vector.shape_cast %66 : vector<2x32xf32> to vector<2x32x1xf32>
      %cst_31 = arith.constant dense<0.000000e+00> : vector<2x1xf32>
      %68 = vector.multi_reduction <add>, %67, %cst_31 [1] : vector<2x32x1xf32> to vector<2x1xf32>
      %69 = vector.shape_cast %68 : vector<2x1xf32> to vector<2x1x1xf32>
      %cst_32 = arith.constant 1.22070313E-4 : f32
      %70 = vector.broadcast %cst_32 : f32 to vector<2x1x1xf32>
      %71 = arith.mulf %69, %70 : vector<2x1x1xf32>
      %72 = vector.broadcast %71 : vector<2x1x1xf32> to vector<2x32x256xf32>
      %73 = arith.subf %65, %72 : vector<2x32x256xf32>
      %74 = arith.mulf %73, %73 : vector<2x32x256xf32>
      %cst_33 = arith.constant dense<0.000000e+00> : vector<2x32xf32>
      %75 = vector.multi_reduction <add>, %74, %cst_33 [2] : vector<2x32x256xf32> to vector<2x32xf32>
      %76 = vector.shape_cast %75 : vector<2x32xf32> to vector<2x32x1xf32>
      %cst_34 = arith.constant dense<0.000000e+00> : vector<2x1xf32>
      %77 = vector.multi_reduction <add>, %76, %cst_34 [1] : vector<2x32x1xf32> to vector<2x1xf32>
      %78 = vector.shape_cast %77 : vector<2x1xf32> to vector<2x1x1xf32>
      %cst_35 = arith.constant 1.22070313E-4 : f32
      %79 = vector.broadcast %cst_35 : f32 to vector<2x1x1xf32>
      %80 = arith.mulf %78, %79 : vector<2x1x1xf32>
      %cst_36 = arith.constant 9.99999974E-6 : f32
      %81 = vector.broadcast %cst_36 : f32 to vector<2x1x1xf32>
      %82 = arith.addf %80, %81 : vector<2x1x1xf32>
      %83 = math.rsqrt %82 : vector<2x1x1xf32>
      %84 = vector.broadcast %83 : vector<2x1x1xf32> to vector<2x32x256xf32>
      %85 = arith.mulf %73, %84 : vector<2x32x256xf32>
      %86 = vector.shape_cast %85 : vector<2x32x256xf32> to vector<64x256xf32>
      %c0_37 = arith.constant 0 : index
      %c2 = arith.constant 2 : index
      %87 = vector.load %arg5[%c0_37, %c2] : memref<65x4xf32, #tpu.memory_space<vmem>>, vector<64x1xf32>
      %88 = vector.broadcast %87 : vector<64x1xf32> to vector<64x256xf32>
      %89 = arith.mulf %86, %88 : vector<64x256xf32>
      %c0_38 = arith.constant 0 : index
      %c3 = arith.constant 3 : index
      %90 = vector.load %arg5[%c0_38, %c3] : memref<65x4xf32, #tpu.memory_space<vmem>>, vector<64x1xf32>
      %91 = vector.broadcast %90 : vector<64x1xf32> to vector<64x256xf32>
      %92 = arith.addf %89, %91 : vector<64x256xf32>
      %cst_39 = arith.constant 0.000000e+00 : f32
      %93 = vector.broadcast %cst_39 : f32 to vector<64x256xf32>
      %94 = arith.maximumf %92, %93 : vector<64x256xf32>
      %95 = arith.addf %48, %94 : vector<64x256xf32>
      %c0_40 = arith.constant 0 : index
      %c0_41 = arith.constant 0 : index
      %c0_42 = arith.constant 0 : index
      %96 = vector.load %arg6[%c0_40, %c0_41, %c0_42] : memref<1x64x256xf32, #tpu.memory_space<vmem>>, vector<1x64x256xf32>
      %97 = vector.shape_cast %96 : vector<1x64x256xf32> to vector<64x256xf32>
      %98 = vector.shape_cast %95 : vector<64x256xf32> to vector<1x64x256xf32>
      tpu.vector_store %arg6[%c0_40, %c0_41, %c0_42], %98 {strides = array<i32>} : memref<1x64x256xf32, #tpu.memory_space<vmem>>, vector<1x64x256xf32>,
    } else {
    }
    return
  }
  func.func @transform_0(%arg0: i32, %arg1: i32) -> (i32, i32, i32) {
    %c0_i32 = arith.constant 0 : i32
    %c0_i32_0 = arith.constant 0 : i32
    %c0_i32_1 = arith.constant 0 : i32
    return %arg0, %c0_i32, %c0_i32_0 : i32, i32, i32
  }
  func.func @transform_1(%arg0: i32, %arg1: i32) -> (i32, i32, i32) {
    %c0_i32 = arith.constant 0 : i32
    %c0_i32_0 = arith.constant 0 : i32
    %c0_i32_1 = arith.constant 0 : i32
    return %arg0, %c0_i32, %c0_i32_0 : i32, i32, i32
  }
  func.func @transform_2(%arg0: i32, %arg1: i32) -> (i32, i32) {
    %c0_i32 = arith.constant 0 : i32
    %c0_i32_0 = arith.constant 0 : i32
    %c0_i32_1 = arith.constant 0 : i32
    return %c0_i32, %c0_i32_0 : i32, i32
  }
  func.func @transform_3(%arg0: i32, %arg1: i32) -> (i32, i32) {
    %c0_i32 = arith.constant 0 : i32
    %c0_i32_0 = arith.constant 0 : i32
    %c0_i32_1 = arith.constant 0 : i32
    return %c0_i32, %c0_i32_0 : i32, i32
  }
  func.func @transform_4(%arg0: i32, %arg1: i32) -> (i32, i32, i32) {
    %c0_i32 = arith.constant 0 : i32
    %c0_i32_0 = arith.constant 0 : i32
    %c0_i32_1 = arith.constant 0 : i32
    return %arg0, %c0_i32, %c0_i32_0 : i32, i32, i32
  }
}

</mosaic_0001>

<bundles_post_ra>
// kernel: tpu_custom_call.1
= control target key start
LH: loop header
LB: loop body
LE: loop exit
PB: predicated region body
PF: predicated region fallthrough
CT: control target
= control target key end

     0   :  { %9 = vsyncpa [#allocation5], 0  ;;  %s3231_s0 = inlined_call_operand.hbm [shape: f32[2,64,256], index: 0, kind: input, shape index: {}]   ;;  %s3232_s1 = inlined_call_operand.vmem [shape: f32[2,1,256], index: 1, kind: input, shape index: {}]   ;;  %s3233_s2 = inlined_call_operand.vmem [shape: bf16[145,64], index: 2, kind: input, shape index: {}]   ;;  %s3234_s3 = inlined_call_operand.vmem [shape: f32[65,4], index: 3, kind: input, shape index: {}]   ;;  %s3235_s4 = inlined_call_operand.hbm [shape: f32[2,64,256], index: 4, kind: output, shape index: {}]  }
   0x1   :  { %11 = vsyncpa [#allocation5 + $0x1], 0 }
   0x2   :  { %12 = vsyncpa [#allocation6], 0 }
   0x3   :  { %14 = vsyncpa [#allocation6 + $0x1], 0  ;;  %s2367_s15 = smov 0   ;;  %s2369_s16 = smov 0  }
   0x4   :  { %s2371_s17 = smov 0   ;;  %s2373_s18 = smov 0  }
   0x5   :  { %s2375_s19 = smov 0   ;;  %s2377_s20 = smov 0  }
   0x6   :  { %s2379_s21 = smov 0   ;;  %s2381_s22 = smov 0  }
   0x7 LB: > { %s1911_s23 = sadd.s32 4294967295, %s2325_s22   ;;  %s1912_s24 = sadd.s32 4294967294, %s2325_s22   ;;  %s2325_s22 = sphi %s2381_s22, %s20_s22   ;;  %s2321_s21 = sphi %s2379_s21, %s3254_s21   ;;  %s2317_s20 = sphi %s2377_s20, %s3253_s20   ;;  %s2313_s19 = sphi %s2375_s19, %s3252_s19   ;;  %s2309_s18 = sphi %s2373_s18, %s3251_s18   ;;  %s2305_s17 = sphi %s2371_s17, %s3250_s17   ;;  %s2301_s16 = sphi %s2369_s16, %s3249_s16   ;;  %s2297_s15 = sphi %s2367_s15, %s3248_s15  }
   0x8   : > { %s29_s25 = sadd.s32 1, %s2317_s20  ;;  %s32_s26 = sadd.s32 1, %s2321_s21 }
   0x9   : > { %p30_p0 = scmp.ge.s32.totalorder %s29_s25, 2  ;;  %s39_s27 = sadd.s32 1, %s2305_s17 }
   0xa   : > { %p46_p1 = scmp.ne.s32.totalorder %s2305_s17, %s2301_s16  ;;  %p47_p2 = scmp.eq.s32.totalorder %s2325_s22, 0 }
   0xb   : > { %s3256_s25 = smov (%p30_p0, %s29_s25), 0  ;;  %s3258_s26 = smov (!%p30_p0, %s32_s26), %s2321_s21 }
   0xc   : > { %p2418_p3 = por %p47_p2, %p46_p1  ;;  %p52_p4 = scmp.ne.s32.totalorder %s2301_s16, %s2297_s15 }
   0xd   : > { %p34_p5 = scmp.ge.s32.totalorder %s3258_s26, 2  ;;  %p53_p6 = scmp.eq.s32.totalorder %s1911_s23, 0 }
   0xe   : > { %p144_p7 = scmp.eq.s32.totalorder %s1911_s23, 3  ;;  %p150_p8 = scmp.eq.s32.totalorder %s1912_s24, 3 }
   0xf   : > { %s3260_s26 = smov (%p34_p5, %s3258_s26), 0  ;;  %p2426_p9 = por %p53_p6, %p52_p4 }
  0x10   : > { %p2430_p10 = por %p144_p7, %p46_p1  ;;  %s36_s5 = ssub.s32 %s2321_s21, %s3260_s26 }
  0x11   : > { %p2436_p11 = por %p150_p8, %p52_p4  ;;  %p37_p12 = scmp.eq.s32.totalorder %s36_s5, 0 }
  0x12   : > { %s3240_s30 = scalar_select %p2430_p10, 1, 0 }
  0x13   : > { %s3241_s6 = scalar_select %p2436_p11, 1, 0 }
  0x14   : > { %p2028_p13 = scmp.lt.s32.totalorder %s2325_s22, 4  ;;  %s176_s7 = sand.u32 1, %s2305_s17  }
  0x15   : > { %s2443_s8 = scalar_select %p37_p12, %s2305_s17, %s39_s27  }
  0x16   : > { %s1915_s9 = sshll.u32 %s176_s7, 7  ;;  %s1961_s10 = sshll.u32 %s2321_s21, 11 }
  0x17   : > { %s2449_s13 = scalar_lea.hbm %s3231_s0, %s1961_s10  ;;  %s180_s14 = scalar_lea.vmem [#allocation4], %s1915_s9 }
  0x18   : > { %s187_s23 = sshll.u32 %s180_s14, 4  ;;  %p2455_p0 = pnand %p2028_p13, %p2418_p3  ;;  %s2451_s23 = int_to_ptr.vmem [resolvable:$true] %s187_s23 }
  0x19   : > { %s2460_s27 = scalar_lea.sflag [#allocation5], %s176_s7  ;;  %s2197_s5 = scalar_lea.hbm %s2449_s13, 2048 }
  0x1a   : > { %p2198_p2 = scmp.ne.s32.totalorder %s2449_s13, %s2197_s5  ;;  %p2199_p4 = pneg %p2455_p0 }
  0x1b   : > { %s2202_s28 = scalar_lea.hbm %s3231_s0, 4096  ;;  %p2203_p3 = scmp.lt.u32.totalorder %s2449_s13, %s3231_s0 }
  0x1c   : > { %p2200_p5 = pnand %p2199_p4, %p2198_p2  ;;  %p2204_p7 = scmp.lt.u32.totalorder %s2202_s28, %s2197_s5 }
  0x1d   : > { %p2206_p12 = scmp.lt.u32.totalorder %s2197_s5, %s2449_s13 }
  0x1e   : > { %p2201_p6 = pneg %p2200_p5  ;;  %p2205_p8 = por %p2204_p7, %p2203_p3 }
  0x20   : > { %p2207_p13 = por %p2206_p12, %p2205_p8 }
  0x22   : > { %p2208_p1 = pnand %p2207_p13, %p2201_p6 }
  0x24   : > { %2211 = shalt.err (!%p2208_p1)
}
  0x25   : > { %s2212_s7 = scalar_lea.vmem %s2451_s23, 2048  ;;  %s2327_s14 = smov [#allocation4]  }
  0x26   : > { %p2213_p2 = scmp.ne.s32.totalorder %s2451_s23, %s2212_s7  ;;  %s2217_s9 = sshll.u32 %s2327_s14, 4  ;;  %s2218_s9 = int_to_ptr.vmem [resolvable:$false] %s2217_s9 }
  0x27   : > { %s2219_s10 = scalar_lea.vmem %s2218_s9, 4096  ;;  %p2220_p10 = scmp.lt.s32.totalorder %s2451_s23, %s2218_s9 }
  0x28   : > { %p2215_p5 = pnand %p2213_p2, %p2199_p4  ;;  %p2221_p3 = scmp.lt.s32.totalorder %s2219_s10, %s2212_s7 }
  0x2a   : > { %p2216_p11 = pneg %p2215_p5  ;;  %p2222_p7 = por %p2221_p3, %p2220_p10 }
  0x2c   : > { %p2223_p8 = pnand %p2222_p7, %p2216_p11 }
  0x2e   : > { %2226 = shalt.err (!%p2223_p8)
}
  0x2f   : > { %s2328_s5 = smov 256   ;;  %s2329_s28 = smov 16  }
  0x30   : > { %2023 = dma.hbm_to_vmem [thread:$0]  (!%p2455_p0), %s2449_s13, 2048, %s2451_s23, %s2460_s27, %s2328_s5, %s2328_s5, %s2329_s28  }
  0x31   : > { %p202_p1 = scmp.lt.s32.totalorder %s2325_s22, 5  ;;  %p3243_p4 = scmp.ge.s32.totalorder %s2325_s22, 1 }
  0x33   : > { %p203_p6 = pnand %p3243_p4, %p202_p1 }
  0x34   : > { %s2492_s11 = sand.u32 (!%p203_p6), 1, %s2301_s16  }
  0x35   : > { %206 = sbr.rel (%p203_p6) target bundleno = 1935 (0x78f), region = 36  ;;  %s1919_s12 = sshll.u32 (!%p203_p6), %s2492_s11, 7 }
  0x36   : > { %s209_s7 = scalar_lea.sflag (!%p203_p6), [#allocation5], %s2492_s11  ;;  %s2496_s14 = scalar_lea.vmem (!%p203_p6), [#allocation4], %s1919_s12 }
  0x3c   : > { %2288 = dma.done.wait (%p2426_p9), %s209_s7, 2048  }
  0x3d   : > { %2290 = vsyncadd (%p2426_p9), %s209_s7, 4294965248  ;;  %p241_p10 = scmp.lt.s32.totalorder %s2313_s19, 1  ;;  %s2509_s10 = scalar_lea.vmem [#allocation7], %s1919_s12 }
  0x3e   : > { %p1922_p11 = scmp.ne.s32.totalorder %s2309_s18, 0 }
  0x3f   : > { %s242_s13 = scalar_select %p241_p10, %s2313_s19, 1 }
  0x40   : > { %249 = sbr.rel (%p1922_p11) target bundleno = 301 (0x12d), region = 44  ;;  %v251_v0 = vld [vmem:[%s2496_s14 + $0x8] sm:$0xff] (!%p1922_p11)  ;;  %v253_v1 = vld [vmem:[%s2496_s14 + $0x18] sm:$0xff] (!%p1922_p11)  ;;  %v250_v2 = vld [vmem:[%s2496_s14] sm:$0xff] (!%p1922_p11)  ;;  %v2330_v7 = vmov (!%p1922_p11), 0   ;;  %vm281_vm0 = vcmask (!%p1922_p11), 523264  }
  0x41   : > { %s1921_s23 = sshll.u32 %s242_s13, 1  ;;  %v267_v3 = vpack.c.bf16 (!%p1922_p11), %v253_v1, %v251_v0  ;;  %v252_v4 = vld [vmem:[%s2496_s14 + $0x10] sm:$0xff] (!%p1922_p11)  ;;  %v255_v5 = vld [vmem:[%s2496_s14 + $0x28] sm:$0xff] (!%p1922_p11)  ;;  %v257_v6 = vld [vmem:[%s2496_s14 + $0x38] sm:$0xff] (!%p1922_p11)  ;;  %317 = vmatprep.mubr.bf16.mxu0 (!%p1922_p11), %v2330_v7  ;;  %v2331_v26 = vmov (!%p1922_p11), 0.0  }
  0x42   : > { %s2507_s9 = scalar_lea.vmem %s3232_s1, %s1921_s23  ;;  %v266_v8 = vpack.c.bf16 (!%p1922_p11), %v252_v4, %v250_v2  ;;  %v269_v9 = vpack.c.bf16 (!%p1922_p11), %v257_v6, %v255_v5  ;;  %v254_v10 = vld [vmem:[%s2496_s14 + $0x20] sm:$0xff] (!%p1922_p11)  ;;  %v256_v11 = vld [vmem:[%s2496_s14 + $0x30] sm:$0xff] (!%p1922_p11)  ;;  %v259_v12 = vld [vmem:[%s2496_s14 + $0x48] sm:$0xff] (!%p1922_p11)  ;;  %332 = vst [vmem:[#allocation3] sm:$0xff] (!%p1922_p11), %v2331_v26 }
  0x43   : > { %285 = vmatprep.subr.bf16.mxu0 (!%p1922_p11), %v267_v3  ;;  %v261_v13 = vld [vmem:[%s2496_s14 + $0x58] sm:$0xff] (!%p1922_p11)  ;;  %v268_v14 = vpack.c.bf16 (!%p1922_p11), %v256_v11, %v254_v10  ;;  %v258_v15 = vld [vmem:[%s2496_s14 + $0x40] sm:$0xff] (!%p1922_p11)  ;;  %v260_v17 = vld [vmem:[%s2496_s14 + $0x50] sm:$0xff] (!%p1922_p11)  ;;  %333 = vst [vmem:[#allocation3 + $0x8] sm:$0xff] (!%p1922_p11), %v2331_v26 }
  0x44   : > { %286 = vmatpush1.bf16.msra.mxu0 (!%p1922_p11), %v266_v8  ;;  %v271_v16 = vpack.c.bf16 (!%p1922_p11), %v261_v13, %v259_v12  ;;  %v263_v18 = vld [vmem:[%s2496_s14 + $0x68] sm:$0xff] (!%p1922_p11)  ;;  %v265_v19 = vld [vmem:[%s2496_s14 + $0x78] sm:$0xff] (!%p1922_p11)  ;;  %v270_v20 = vpack.c.bf16 (!%p1922_p11), %v260_v17, %v258_v15  ;;  %v262_v22 = vld [vmem:[%s2496_s14 + $0x60] sm:$0xff] (!%p1922_p11)  ;;  %334 = vst [vmem:[#allocation3 + $0x10] sm:$0xff] (!%p1922_p11), %v2331_v26 }
  0x45   : > { %287 = vmatprep.subr.bf16.mxu0 (!%p1922_p11), %v269_v9  ;;  %v273_v21 = vpack.c.bf16 (!%p1922_p11), %v265_v19, %v263_v18  ;;  %v264_v23 = vld [vmem:[%s2496_s14 + $0x70] sm:$0xff] (!%p1922_p11)  ;;  %v2107_v25 = vld [vmem:[%s3233_s2] sm:$0xff] (!%p1922_p11)   ;;  %335 = vst [vmem:[#allocation3 + $0x18] sm:$0xff] (!%p1922_p11), %v2331_v26  ;;  %336 = vst [vmem:[#allocation3 + $0x20] sm:$0xff] (!%p1922_p11), %v2331_v26 }
  0x46   : > { %v272_v24 = vpack.c.bf16 (!%p1922_p11), %v264_v23, %v262_v22  ;;  %337 = vst [vmem:[#allocation3 + $0x28] sm:$0xff] (!%p1922_p11), %v2331_v26  ;;  %338 = vst [vmem:[#allocation3 + $0x30] sm:$0xff] (!%p1922_p11), %v2331_v26 }
  0x47   : > { %339 = vst [vmem:[#allocation3 + $0x38] sm:$0xff] %v2331_v26  ;;  %340 = vst [vmem:[#allocation3 + $0x40] sm:$0xff] %v2331_v26 }
  0x48   : > { %288 = vmatpush1.bf16.msra.mxu0 %v268_v14  ;;  %341 = vst [vmem:[#allocation3 + $0x48] sm:$0xff] %v2331_v26  ;;  %342 = vst [vmem:[#allocation3 + $0x50] sm:$0xff] %v2331_v26 }
  0x49   : > { %289 = vmatprep.subr.bf16.mxu0 %v271_v16  ;;  %343 = vst [vmem:[#allocation3 + $0x58] sm:$0xff] %v2331_v26  ;;  %344 = vst [vmem:[#allocation3 + $0x60] sm:$0xff] %v2331_v26 }
  0x4a   : > { %345 = vst [vmem:[#allocation3 + $0x68] sm:$0xff] %v2331_v26  ;;  %346 = vst [vmem:[#allocation3 + $0x70] sm:$0xff] %v2331_v26 }
  0x4b   : > { %347 = vst [vmem:[#allocation3 + $0x78] sm:$0xff] %v2331_v26  ;;  %348 = vst [vmem:[#allocation3 + $0x80] sm:$0x1] %v2331_v26 }
  0x4c   : > { %290 = vmatpush1.bf16.msra.mxu0 %v270_v20  ;;  %349 = vst [vmem:[#allocation3 + $0x88] sm:$0x1] %v2331_v26 }
  0x4d   : > { %291 = vmatprep.subr.bf16.mxu0 %v273_v21 }
  0x50   : > { %292 = vmatpush1.bf16.msra.mxu0 %v272_v24 }
  0x53   : > { %1924 = vmatmul.mubr.msk.bf16.vlgmr.msra.gmra.mrb[0].mxu0 %vm281_vm0, %v2107_v25 }
 0x126   : > { %v319_v27 = vpop.f32.mrb[0].mxu0 }
 0x127   : > { %v321_v28 = vpop.f32.mrb[1].mxu0 }
 0x128   : > { %v323_v29 = vpop.f32.mrb[2].mxu0 }
 0x129   : > { %v328_v30 = vpack.c.bf16 %v323_v29, %v319_v27  ;;  %v325_v31 = vpop.f32.mrb[3].mxu0 }
 0x12a   : > { %v329_v32 = vpack.c.bf16 %v325_v31, %v321_v28 }
 0x12b   : > { %330 = vst [vmem:[#allocation2] sm:$0xff] %v328_v30 }
 0x12c   : > { %331 = vst [vmem:[#allocation2 + $0x8] sm:$0xff] %v329_v32 }
 0x12d PF: > { %s1925_s28 = sshll.u32 %s2309_s18, 7  ;;  %v2332_v33 = vmov 0.0   ;;  %vm2333_vm1 = vmmov 0   ;;  %v2334_v35 = vmov 0   ;;  %vm469_vm2 = vcmask 523264   ;;  %v2111_v5 = vld [vmem:[%s3233_s2 + $0x28] sm:$0xff]  }
 0x12e   : > { %s351_s12 = sshra.s32 %s1925_s28, 7  ;;  %2000 = vmatprep.subr.bf16.mxu1 %v2332_v33  ;;  %1996 = vmatprep.mubr.msk.bf16.mxu1 %vm2333_vm1, %v2332_v33  ;;  %v2110_v55 = vld [vmem:[%s3233_s2 + $0x48] ss:$0 sps:$4 sm:$0x11]   ;;  %vm575_vm3 = vcmask 130048   ;;  %v2112_v30 = vld [vmem:[%s3233_s2 + $0x30] sm:$0xff]  }
 0x12f   : > { %s1926_s7 = sshll.u32 %s351_s12, 3  ;;  %s356_s13 = scalar_lea.vmem %s2507_s9, %s351_s12  ;;  %1972 = vmatprep.subr.bf16.mxu0 %v2332_v33  ;;  %1980 = vmatprep.mubr.msk.bf16.mxu0 %vm2333_vm1, %v2332_v33  ;;  %vm996_vm4 = vcmask 130112   ;;  %vm1003_vm5 = vcmask 195712   ;;  %vm1010_vm6 = vcmask 261312   ;;  %vm1017_vm7 = vcmask 326912  }
 0x130   : > { %v1927_v34 = vld [vmem:[%s356_s13] ss:$0 sm:$0xff]  ;;  %s370_s23 = scalar_lea.vmem %s2496_s14, %s1926_s7 [#allocation4]  ;;  %2108 = vset.pattern.permute.xlu1 %v2334_v35  ;;  %s354_s24 = scalar_lea.vmem [#allocation2], %s1926_s7  ;;  %vm1024_vm8 = vcmask 392512   ;;  %vm1031_vm9 = vcmask 458112   ;;  %vm1038_vm10 = vcmask 523712  }
 0x131   : > { %v371_v37 = vld [vmem:[%s370_s23] sm:$0xff]  ;;  %v372_v38 = vld [vmem:[%s370_s23 + $0x10] sm:$0xff]  ;;  %vm1045_vm11 = vcmask 589312   ;;  %vm1052_vm12 = vcmask 654912   ;;  %vm1059_vm13 = vcmask 720512   ;;  %vm1066_vm14 = vcmask 786112  }
 0x132   : > { %v379_v41 = vpack.c.bf16 %v372_v38, %v371_v37  ;;  %v373_v42 = vld [vmem:[%s370_s23 + $0x20] sm:$0xff]  ;;  %v374_v43 = vld [vmem:[%s370_s23 + $0x30] sm:$0xff]  ;;  %vm1073_vm15 = vcmask 851712   ;;  %vm1080_vm0 = vcmask 917312   ;;  %p1947_p9 = scmp.ne.s32.totalorder %s2309_s18, 1 }
 0x133   : > { %v355_v36 = vld [vmem:[%s354_s24] sm:$0xff]  ;;  %v376_v45 = vld [vmem:[%s370_s23 + $0x50] sm:$0xff]  ;;  %v380_v48 = vpack.c.bf16 %v374_v43, %v373_v42  ;;  %v558_v54 = vld [vmem:[#allocation2 + $0x8] sm:$0xff] }
 0x134   : > { %v358_v39 = vunpack.c.l.bf16 %v355_v36  ;;  %v359_v40 = vunpack.c.h.bf16 %v355_v36  ;;  %v375_v44 = vld [vmem:[%s370_s23 + $0x40] sm:$0xff]  ;;  %2004 = vmatpush3.bf16.msra.mxu1 %v379_v41  ;;  %1973 = vmatpush3.bf16.msra.mxu0 %v379_v41  ;;  %v378_v52 = vld [vmem:[%s370_s23 + $0x70] sm:$0xff] }
 0x135   : > { %2001 = vmatprep.subr.bf16.mxu1 %v2332_v33  ;;  %1974 = vmatprep.subr.bf16.mxu0 %v2332_v33  ;;  %v381_v50 = vpack.c.bf16 %v376_v45, %v375_v44  ;;  %v377_v51 = vld [vmem:[%s370_s23 + $0x60] sm:$0xff] }
 0x136   : > { %v366_v46 = vmul.f32 %v1927_v34, %v358_v39  ;;  %v367_v47 = vmul.f32 %v1927_v34, %v359_v40  ;;  %v382_v53 = vpack.c.bf16 %v378_v52, %v377_v51  ;;  %v557_v56 = vld [vmem:[#allocation2] sm:$0xff]  ;;  %v2113_v39 = vld [vmem:[%s3233_s2 + $0x38] sm:$0xff]  }
 0x138   : > { %v368_v49 = vpack.c.bf16 %v367_v47, %v366_v46  ;;  %2005 = vmatpush3.bf16.msra.mxu1 %v380_v48  ;;  %1975 = vmatpush3.bf16.msra.mxu0 %v380_v48  ;;  %v2114_v46 = vld [vmem:[%s3233_s2 + $0x40] sm:$0xff]  }
 0x139   : > { %2002 = vmatprep.subr.bf16.mxu1 %v2332_v33  ;;  %1976 = vmatprep.subr.bf16.mxu0 %v2332_v33 }
 0x13a   : > { %559 = vxpose.xlu0.c.b16.start.end [1/1] (short) %v368_v49, 128 }
 0x13c   : > { %2006 = vmatpush3.bf16.msra.mxu1 %v381_v50  ;;  %1977 = vmatpush3.bf16.msra.mxu0 %v381_v50 }
 0x13d   : > { %2003 = vmatprep.subr.bf16.mxu1 %v2332_v33  ;;  %1978 = vmatprep.subr.bf16.mxu0 %v2332_v33 }
 0x140   : > { %2007 = vmatpush3.bf16.msra.mxu1 %v382_v53  ;;  %1979 = vmatpush3.bf16.msra.mxu0 %v382_v53 }
 0x141   : > { %600 = vmatprep.subr.bf16.mxu1 %v558_v54 }
 0x143   : > { %2109 = vset.pattern.permute.xlu0 %v2334_v35  ;;  %1997 = vmatmul.mubr.msk.bf16.vlgmr.msra.gmra.mrb[0].mxu1 %vm469_vm2, %v2110_v55 }
 0x144   : > { %601 = vmatpush1.bf16.msra.mxu1 %v557_v56  ;;  %632 = vmatprep.mubr.bf16.mxu1 %v2334_v35 }
 0x145   : > { %1981 = vmatmul.mubr.msk.bf16.vlgmr.msra.gmra.mrb[0].mxu0 %vm469_vm2, %v2111_v5 }
 0x146   : > { %1984 = vmatprep.mubr.msk.bf16.mxu0 %vm2333_vm1, %v2332_v33 }
 0x14d   : > { %1985 = vmatmul.mubr.msk.bf16.gmra.mrb[4].mxu0 %vm469_vm2, %v2112_v30 }
 0x14e   : > { %1988 = vmatprep.mubr.msk.bf16.mxu0 %vm2333_vm1, %v2332_v33 }
 0x155   : > { %1989 = vmatmul.mubr.msk.bf16.gmra.mrb[8].mxu0 %vm469_vm2, %v2113_v39 }
 0x156   : > { %1992 = vmatprep.mubr.msk.bf16.mxu0 %vm2333_vm1, %v2332_v33  ;;  %vm1087_vm1 = vcmask 982912  }
 0x15d   : > { %1993 = vmatmul.mubr.msk.bf16.gmra.mrb[12].mxu0 %vm469_vm2, %v2114_v46 }
 0x15e   : > { %1174 = vmatprep.mubr.bf16.mxu0 %v2334_v35 }
 0x1a0   : > { %v567_v57 = vpop.trf.xlu0 }
 0x1a1   : > { %1939 = vmatmul.mubr.msk.bf16.vlgmr.msra.gmra.mrb[4].mxu1 %vm575_vm3, %v567_v57 }
 0x1a2   : > { %642 = vmatprep.mubr.bf16.mxu1 %v2334_v35 }
 0x1a4   : > { %v568_v58 = vpop.trf.xlu0 }
 0x1a8   : > { %v569_v59 = vpop.trf.xlu0 }
 0x1a9   : > { %1940 = vmatmul.mubr.msk.bf16.gmra.mrb[8].mxu1 %vm575_vm3, %v568_v58  ;;  %v392_v58 = vld [vmem:[%s3234_s3] sm:$0xff] }
 0x1aa   : > { %652 = vmatprep.mubr.bf16.mxu1 %v2334_v35 }
 0x1ac   : > { %v570_v60 = vpop.trf.xlu0 }
 0x1b0   : > { %v571_v61 = vpop.trf.xlu0 }
 0x1b1   : > { %1941 = vmatmul.mubr.msk.bf16.gmra.mrb[12].mxu1 %vm575_vm3, %v569_v59 }
 0x1b2   : > { %662 = vmatprep.mubr.bf16.mxu1 %v2334_v35 }
 0x1b4   : > { %v572_v62 = vpop.trf.xlu0 }
 0x1b8   : > { %v573_v63 = vpop.trf.xlu0 }
 0x1b9   : > { %1942 = vmatmul.mubr.msk.bf16.gmra.mrb[16].mxu1 %vm575_vm3, %v570_v60 }
 0x1ba   : > { %672 = vmatprep.mubr.bf16.mxu1 %v2334_v35 }
 0x1bc   : > { %v574_v0 = vpop.trf.xlu0 }
 0x1c1   : > { %1943 = vmatmul.mubr.msk.bf16.gmra.mrb[20].mxu1 %vm575_vm3, %v571_v61 }
 0x1c2   : > { %682 = vmatprep.mubr.bf16.mxu1 %v2334_v35 }
 0x1c9   : > { %1944 = vmatmul.mubr.msk.bf16.gmra.mrb[24].mxu1 %vm575_vm3, %v572_v62 }
 0x1ca   : > { %692 = vmatprep.mubr.bf16.mxu1 %v2334_v35 }
 0x1d1   : > { %1945 = vmatmul.mubr.msk.bf16.gmra.mrb[28].mxu1 %vm575_vm3, %v573_v63 }
 0x1d2   : > { %702 = vmatprep.mubr.bf16.mxu1 %v2334_v35 }
 0x1d9   : > { %1946 = vmatmul.mubr.msk.bf16.gmra.mrb[32].mxu1 %vm575_vm3, %v574_v0  ;;  %vm1094_vm3 = vcmask 1048512  }
 0x216   : > { %v2568_v1 = vpop.f32.mrb[0].mxu1 }
 0x217   : > { %v1998_v2 = vpop.f32.mrb[1].mxu1 }
 0x218   : > { %v554_v3 = vpop.f32.mrb[2].mxu1  ;;  %v2692_v61 = vpop.f32.mrb[0].mxu0 }
 0x219   : > { %v1999_v4 = vpop.f32.mrb[3].mxu1  ;;  %v1982_v3 = vpop.f32.mrb[1].mxu0 }
 0x274   : > { %v2576_v6 = vpop.f32.mrb[4].mxu1 }
 0x275   : > { %v2578_v7 = vpop.f32.mrb[5].mxu1 }
 0x276   : > { %v2580_v8 = vpop.f32.mrb[6].mxu1  ;;  %v713_v9 = vmax.f32 %v2576_v6, %v2578_v7 }
 0x277   : > { %v2584_v10 = vpop.f32.mrb[7].mxu1 }
 0x278   : > { %714 = vmax.xlane.f32.xlu0 %v713_v9  ;;  %v716_v11 = vmax.f32 %v2580_v8, %v2584_v10 }
 0x27a   : > { %717 = vmax.xlane.f32.xlu1 %v716_v11 }
 0x27c   : > { %v2588_v12 = vpop.f32.mrb[8].mxu1 }
 0x27d   : > { %v2590_v13 = vpop.f32.mrb[9].mxu1 }
 0x27e   : > { %v2592_v14 = vpop.f32.mrb[10].mxu1  ;;  %v719_v15 = vmax.f32 %v2588_v12, %v2590_v13 }
 0x27f   : > { %v2596_v16 = vpop.f32.mrb[11].mxu1 }
 0x280   : > { %720 = vmax.xlane.f32.xlu1 %v719_v15  ;;  %v722_v17 = vmax.f32 %v2592_v14, %v2596_v16 }
 0x284   : > { %723 = vmax.xlane.f32.xlu1 %v722_v17  ;;  %v2600_v18 = vpop.f32.mrb[12].mxu1 }
 0x285   : > { %v2602_v19 = vpop.f32.mrb[13].mxu1 }
 0x286   : > { %v2604_v20 = vpop.f32.mrb[14].mxu1  ;;  %v725_v21 = vmax.f32 %v2600_v18, %v2602_v19 }
 0x287   : > { %v2608_v22 = vpop.f32.mrb[15].mxu1 }
 0x288   : > { %726 = vmax.xlane.f32.xlu1 %v725_v21  ;;  %v728_v23 = vmax.f32 %v2604_v20, %v2608_v22 }
 0x28c   : > { %729 = vmax.xlane.f32.xlu1 %v728_v23  ;;  %v2612_v24 = vpop.f32.mrb[16].mxu1 }
 0x28d   : > { %v2614_v25 = vpop.f32.mrb[17].mxu1 }
 0x28e   : > { %v2616_v26 = vpop.f32.mrb[18].mxu1  ;;  %v731_v27 = vmax.f32 %v2612_v24, %v2614_v25 }
 0x28f   : > { %v2620_v28 = vpop.f32.mrb[19].mxu1 }
 0x290   : > { %732 = vmax.xlane.f32.xlu1 %v731_v27  ;;  %v734_v29 = vmax.f32 %v2616_v26, %v2620_v28 }
 0x294   : > { %735 = vmax.xlane.f32.xlu1 %v734_v29  ;;  %v2627_v31 = vpop.f32.mrb[20].mxu1 }
 0x295   : > { %v2629_v32 = vpop.f32.mrb[21].mxu1 }
 0x296   : > { %v2632_v34 = vpop.f32.mrb[22].mxu1  ;;  %v737_v36 = vmax.f32 %v2627_v31, %v2629_v32 }
 0x297   : > { %v2638_v37 = vpop.f32.mrb[23].mxu1 }
 0x298   : > { %738 = vmax.xlane.f32.xlu1 %v737_v36  ;;  %v740_v38 = vmax.f32 %v2632_v34, %v2638_v37 }
 0x29c   : > { %741 = vmax.xlane.f32.xlu1 %v740_v38  ;;  %v2645_v40 = vpop.f32.mrb[24].mxu1 }
 0x29d   : > { %v2647_v41 = vpop.f32.mrb[25].mxu1 }
 0x29e   : > { %v2650_v42 = vpop.f32.mrb[26].mxu1  ;;  %v743_v43 = vmax.f32 %v2645_v40, %v2647_v41 }
 0x29f   : > { %v2656_v44 = vpop.f32.mrb[27].mxu1 }
 0x2a0   : > { %744 = vmax.xlane.f32.xlu1 %v743_v43  ;;  %v746_v45 = vmax.f32 %v2650_v42, %v2656_v44 }
 0x2a4   : > { %747 = vmax.xlane.f32.xlu1 %v746_v45  ;;  %v2663_v47 = vpop.f32.mrb[28].mxu1 }
 0x2a5   : > { %v2665_v48 = vpop.f32.mrb[29].mxu1 }
 0x2a6   : > { %v2668_v49 = vpop.f32.mrb[30].mxu1  ;;  %v749_v33 = vmax.f32 %v2663_v47, %v2665_v48 }
 0x2a7   : > { %v2673_v50 = vpop.f32.mrb[31].mxu1 }
 0x2a8   : > { %750 = vmax.xlane.f32.xlu1 %v749_v33  ;;  %v752_v51 = vmax.f32 %v2668_v49, %v2673_v50 }
 0x2aa   : > { %753 = vmax.xlane.f32.xlu0 %v752_v51 }
 0x2ac   : > { %v2677_v52 = vpop.f32.mrb[32].mxu1 }
 0x2ad   : > { %v2679_v53 = vpop.f32.mrb[33].mxu1 }
 0x2ae   : > { %v2681_v54 = vpop.f32.mrb[34].mxu1  ;;  %v755_v55 = vmax.f32 %v2677_v52, %v2679_v53 }
 0x2af   : > { %v2685_v56 = vpop.f32.mrb[35].mxu1 }
 0x2b0   : > { %v758_v57 = vmax.f32 %v2681_v54, %v2685_v56  ;;  %756 = vmax.xlane.f32.xlu1 %v755_v55 }
 0x2b2   : > { %759 = vmax.xlane.f32.xlu0 %v758_v57 }
 0x2c1   : > { %403 = vperm.xlu1 %2108, %v392_v58  }
 0x305   : > { %v715_v59 = vpop.xlane.xlu0 %714 }
 0x306   : > { %v761_v62 = vsub.f32 %v2576_v6, %v715_v59  ;;  %v762_v63 = vsub.f32 %v2578_v7, %v715_v59 }
 0x307   : > { %v718_v60 = vpop.xlane.xlu1 %717 }
 0x308   : > { %v763_v0 = vsub.f32 %v2580_v8, %v718_v60  ;;  %v764_v2 = vsub.f32 %v2584_v10, %v718_v60 }
 0x30a   : > { %v793_v4 = vpack.c.bf16 %v763_v0, %v761_v62  ;;  %v794_v5 = vpack.c.bf16 %v764_v2, %v762_v63 }
 0x30c   : > { %v810_v9 = vmul.bf16 1069105081, %v793_v4  ;;  %v813_v11 = vmul.bf16 1069105081, %v794_v5 }
 0x30d   : > { %v721_v15 = vpop.xlane.xlu1 %720 }
 0x30e   : > { %2115 = vpow.bf16 %v810_v9  ;;  %v765_v21 = vsub.f32 %v2588_v12, %v721_v15  ;;  %v766_v23 = vsub.f32 %v2590_v13, %v721_v15 }
 0x30f   : > { %2117 = vpow.bf16 %v813_v11 }
 0x311   : > { %v724_v17 = vpop.xlane.xlu1 %723 }
 0x312   : > { %v767_v6 = vsub.f32 %v2592_v14, %v724_v17  ;;  %v768_v7 = vsub.f32 %v2596_v16, %v724_v17 }
 0x314   : > { %v795_v8 = vpack.c.bf16 %v767_v6, %v765_v21  ;;  %v796_v27 = vpack.c.bf16 %v768_v7, %v766_v23 }
 0x315   : > { %v727_v10 = vpop.xlane.xlu1 %726 }
 0x316   : > { %v816_v29 = vmul.bf16 1069105081, %v795_v8  ;;  %v819_v30 = vmul.bf16 1069105081, %v796_v27  ;;  %v769_v38 = vsub.f32 %v2600_v18, %v727_v10  ;;  %v770_v39 = vsub.f32 %v2602_v19, %v727_v10 }
 0x318   : > { %2119 = vpow.bf16 %v816_v29 }
 0x319   : > { %v2116_v36 = vpop.eup %2115  ;;  %2121 = vpow.bf16 %v819_v30  ;;  %v730_v43 = vpop.xlane.xlu1 %729 }
 0x31a   : > { %v2118_v12 = vpop.eup %2117  ;;  %v771_v13 = vsub.f32 %v2604_v20, %v730_v43  ;;  %v772_v14 = vsub.f32 %v2608_v22, %v730_v43  ;;  %v859_v45 = vunpack.c.h.bf16 %v2116_v36  ;;  %v857_v16 = vunpack.c.l.bf16 %v2116_v36 }
 0x31b   : > { %1142 = vmatprep.subr.bf16.mxu0 %v2118_v12  ;;  %v860_v46 = vunpack.c.h.bf16 %v2118_v12  ;;  %v858_v33 = vunpack.c.l.bf16 %v2118_v12 }
 0x31c   : > { %v797_v51 = vpack.c.bf16 %v771_v13, %v769_v38  ;;  %v798_v55 = vpack.c.bf16 %v772_v14, %v770_v39  ;;  %1143 = vmatpush1.bf16.msra.mxu0 %v2116_v36 }
 0x31d   : > { %v733_v57 = vpop.xlane.xlu1 %732  ;;  %v892_v58 = vadd.f32 %v860_v46, %v859_v45  ;;  %v889_v59 = vadd.f32 %v858_v33, %v857_v16 }
 0x31e   : > { %v822_v18 = vmul.bf16 1069105081, %v797_v51  ;;  %v825_v60 = vmul.bf16 1069105081, %v798_v55  ;;  %v773_v20 = vsub.f32 %v2612_v24, %v733_v57  ;;  %v774_v22 = vsub.f32 %v2614_v25, %v733_v57 }
 0x31f   : > { %893 = vadd.xlane.f32.xlu0 %v892_v58  ;;  %890 = vadd.xlane.f32.xlu1 %v889_v59 }
 0x320   : > { %2123 = vpow.bf16 %v822_v18 }
 0x321   : > { %2125 = vpow.bf16 %v825_v60  ;;  %v736_v19 = vpop.xlane.xlu1 %735 }
 0x322   : > { %v775_v62 = vsub.f32 %v2616_v26, %v736_v19  ;;  %v776_v63 = vsub.f32 %v2620_v28, %v736_v19 }
 0x323   : > { %v2120_v0 = vpop.eup %2119 }
 0x324   : > { %v2122_v2 = vpop.eup %2121  ;;  %v799_v3 = vpack.c.bf16 %v775_v62, %v773_v20  ;;  %v800_v4 = vpack.c.bf16 %v776_v63, %v774_v22  ;;  %v863_v5 = vunpack.c.h.bf16 %v2120_v0  ;;  %v861_v9 = vunpack.c.l.bf16 %v2120_v0 }
 0x325   : > { %1144 = vmatprep.subr.bf16.mxu0 %v2122_v2  ;;  %v739_v11 = vpop.xlane.xlu1 %738  ;;  %v864_v15 = vunpack.c.h.bf16 %v2122_v2  ;;  %v862_v17 = vunpack.c.l.bf16 %v2122_v2 }
 0x326   : > { %v828_v21 = vmul.bf16 1069105081, %v799_v3  ;;  %v831_v23 = vmul.bf16 1069105081, %v800_v4  ;;  %1145 = vmatpush1.bf16.msra.mxu0 %v2120_v0  ;;  %v777_v26 = vsub.f32 %v2627_v31, %v739_v11  ;;  %v778_v28 = vsub.f32 %v2629_v32, %v739_v11 }
 0x327   : > { %v898_v24 = vadd.f32 %v864_v15, %v863_v5  ;;  %v895_v6 = vadd.f32 %v862_v17, %v861_v9 }
 0x328   : > { %2127 = vpow.bf16 %v828_v21 }
 0x329   : > { %2129 = vpow.bf16 %v831_v23  ;;  %899 = vadd.xlane.f32.xlu0 %v898_v24  ;;  %896 = vadd.xlane.f32.xlu1 %v895_v6  ;;  %v742_v25 = vpop.xlane.xlu1 %741 }
 0x32a   : > { %v779_v7 = vsub.f32 %v2632_v34, %v742_v25  ;;  %v780_v8 = vsub.f32 %v2638_v37, %v742_v25 }
 0x32b   : > { %v2124_v27 = vpop.eup %2123 }
 0x32c   : > { %v2126_v10 = vpop.eup %2125  ;;  %v801_v29 = vpack.c.bf16 %v779_v7, %v777_v26  ;;  %v802_v30 = vpack.c.bf16 %v780_v8, %v778_v28  ;;  %v867_v36 = vunpack.c.h.bf16 %v2124_v27  ;;  %v865_v38 = vunpack.c.l.bf16 %v2124_v27 }
 0x32d   : > { %1146 = vmatprep.subr.bf16.mxu0 %v2126_v10  ;;  %v745_v39 = vpop.xlane.xlu1 %744  ;;  %v868_v43 = vunpack.c.h.bf16 %v2126_v10  ;;  %v866_v12 = vunpack.c.l.bf16 %v2126_v10 }
 0x32e   : > { %v834_v13 = vmul.bf16 1069105081, %v801_v29  ;;  %v837_v14 = vmul.bf16 1069105081, %v802_v30  ;;  %1147 = vmatpush1.bf16.msra.mxu0 %v2124_v27  ;;  %v781_v34 = vsub.f32 %v2645_v40, %v745_v39  ;;  %v782_v37 = vsub.f32 %v2647_v41, %v745_v39 }
 0x32f   : > { %v904_v31 = vadd.f32 %v868_v43, %v867_v36  ;;  %v901_v45 = vadd.f32 %v866_v12, %v865_v38 }
 0x330   : > { %2131 = vpow.bf16 %v834_v13 }
 0x331   : > { %2133 = vpow.bf16 %v837_v14  ;;  %905 = vadd.xlane.f32.xlu0 %v904_v31  ;;  %902 = vadd.xlane.f32.xlu1 %v901_v45  ;;  %v748_v32 = vpop.xlane.xlu1 %747 }
 0x332   : > { %v783_v16 = vsub.f32 %v2650_v42, %v748_v32  ;;  %v784_v46 = vsub.f32 %v2656_v44, %v748_v32 }
 0x333   : > { %v2128_v33 = vpop.eup %2127 }
 0x334   : > { %v2130_v51 = vpop.eup %2129  ;;  %v803_v55 = vpack.c.bf16 %v783_v16, %v781_v34  ;;  %v804_v57 = vpack.c.bf16 %v784_v46, %v782_v37  ;;  %v871_v58 = vunpack.c.h.bf16 %v2128_v33  ;;  %v869_v59 = vunpack.c.l.bf16 %v2128_v33 }
 0x335   : > { %1148 = vmatprep.subr.bf16.mxu0 %v2130_v51  ;;  %v751_v18 = vpop.xlane.xlu1 %750  ;;  %v872_v60 = vunpack.c.h.bf16 %v2130_v51  ;;  %v870_v19 = vunpack.c.l.bf16 %v2130_v51 }
 0x336   : > { %v840_v20 = vmul.bf16 1069105081, %v803_v55  ;;  %v843_v22 = vmul.bf16 1069105081, %v804_v57  ;;  %1149 = vmatpush1.bf16.msra.mxu0 %v2128_v33  ;;  %v785_v40 = vsub.f32 %v2663_v47, %v751_v18  ;;  %v786_v44 = vsub.f32 %v2665_v48, %v751_v18  ;;  %v394_v57 = vld [vmem:[%s3234_s3 + $0x10] sm:$0xff]  ;;  %v395_v18 = vld [vmem:[%s3234_s3 + $0x18] sm:$0xff] }
 0x337   : > { %v754_v41 = vpop.xlane.xlu0 %753  ;;  %v910_v62 = vadd.f32 %v872_v60, %v871_v58  ;;  %v907_v42 = vadd.f32 %v870_v19, %v869_v59  ;;  %v2729_v58 = vpop.f32.mrb[2].mxu0  ;;  %v393_v19 = vld [vmem:[%s3234_s3 + $0x8] sm:$0xff] }
 0x338   : > { %2135 = vpow.bf16 %v840_v20  ;;  %v787_v63 = vsub.f32 %v2668_v49, %v754_v41  ;;  %v788_v0 = vsub.f32 %v2673_v50, %v754_v41  ;;  %v1983_v59 = vpop.f32.mrb[3].mxu0 }
 0x339   : > { %2137 = vpow.bf16 %v843_v22  ;;  %911 = vadd.xlane.f32.xlu0 %v910_v62  ;;  %908 = vadd.xlane.f32.xlu1 %v907_v42  ;;  %v2734_v60 = vpop.f32.mrb[4].mxu0  ;;  %v396_v22 = vld [vmem:[%s3234_s3 + $0x20] sm:$0xff]  ;;  %v397_v62 = vld [vmem:[%s3234_s3 + $0x28] sm:$0xff] }
 0x33a   : > { %v805_v2 = vpack.c.bf16 %v787_v63, %v785_v40  ;;  %v806_v3 = vpack.c.bf16 %v788_v0, %v786_v44  ;;  %v1986_v20 = vpop.f32.mrb[5].mxu0  ;;  %v398_v63 = vld [vmem:[%s3234_s3 + $0x30] sm:$0xff] }
 0x33b   : > { %v2132_v4 = vpop.eup %2131  ;;  %v2742_v40 = vpop.f32.mrb[6].mxu0 }
 0x33c   : > { %v2134_v5 = vpop.eup %2133  ;;  %v846_v9 = vmul.bf16 1069105081, %v805_v2  ;;  %v849_v11 = vmul.bf16 1069105081, %v806_v3  ;;  %v875_v47 = vunpack.c.h.bf16 %v2132_v4  ;;  %v873_v15 = vunpack.c.l.bf16 %v2132_v4  ;;  %v1987_v41 = vpop.f32.mrb[7].mxu0 }
 0x33d   : > { %1150 = vmatprep.subr.bf16.mxu0 %v2134_v5  ;;  %v757_v17 = vpop.xlane.xlu1 %756  ;;  %v876_v21 = vunpack.c.h.bf16 %v2134_v5  ;;  %v874_v23 = vunpack.c.l.bf16 %v2134_v5  ;;  %v2747_v42 = vpop.f32.mrb[8].mxu0 }
 0x33e   : > { %2139 = vpow.bf16 %v846_v9  ;;  %1151 = vmatpush1.bf16.msra.mxu0 %v2132_v4  ;;  %v789_v24 = vsub.f32 %v2677_v52, %v757_v17  ;;  %v790_v6 = vsub.f32 %v2679_v53, %v757_v17  ;;  %v1990_v44 = vpop.f32.mrb[9].mxu0  ;;  %v399_v4 = vld [vmem:[%s3234_s3 + $0x38] sm:$0xff] }
 0x33f   : > { %2141 = vpow.bf16 %v849_v11  ;;  %v760_v48 = vpop.xlane.xlu0 %759  ;;  %v916_v49 = vadd.f32 %v876_v21, %v875_v47  ;;  %v913_v50 = vadd.f32 %v874_v23, %v873_v15  ;;  %v2752_v0 = vpop.f32.mrb[10].mxu0  ;;  %v400_v47 = vld [vmem:[%s3234_s3 + $0x40] sm:$0x1]  ;;  %v985_v21 = vlaneseq }
 0x340   : > { %v791_v25 = vsub.f32 %v2681_v54, %v760_v48  ;;  %v792_v26 = vsub.f32 %v2685_v56, %v760_v48  ;;  %v1991_v2 = vpop.f32.mrb[11].mxu0 }
 0x341   : > { %917 = vadd.xlane.f32.xlu0 %v916_v49  ;;  %914 = vadd.xlane.f32.xlu1 %v913_v50  ;;  %v2754_v3 = vpop.f32.mrb[12].mxu0  ;;  %v2764_v15 = vpop.permute.xlu1 %403  ;;  %v2766_v49 = vand.u32 127, %v985_v21 }
 0x342   : > { %v807_v28 = vpack.c.bf16 %v791_v25, %v789_v24  ;;  %v808_v7 = vpack.c.bf16 %v792_v26, %v790_v6  ;;  %v1994_v5 = vpop.f32.mrb[13].mxu0  ;;  %v2768_v6 = vshrl.u32 %v985_v21, 7 }
 0x343   : > { %v2136_v8 = vpop.eup %2135  ;;  %v2759_v9 = vpop.f32.mrb[14].mxu0  ;;  %v991_v25 = vadd.s32 4294967288, %v2766_v49  ;;  %v1040_v20 = vadd.s32 4294967232, %v2766_v49  ;;  %v1047_v2 = vadd.s32 4294967224, %v2766_v49  ;;  %v1054_v21 = vadd.s32 4294967216, %v2766_v49 }
 0x344   : > { %v2138_v27 = vpop.eup %2137  ;;  %v852_v10 = vmul.bf16 1069105081, %v807_v28  ;;  %v855_v29 = vmul.bf16 1069105081, %v808_v7  ;;  %v879_v30 = vunpack.c.h.bf16 %v2136_v8  ;;  %v877_v36 = vunpack.c.l.bf16 %v2136_v8  ;;  %v1995_v11 = vpop.f32.mrb[15].mxu0 }
 0x345   : > { %1152 = vmatprep.subr.bf16.mxu0 %v2138_v27  ;;  %v880_v38 = vunpack.c.h.bf16 %v2138_v27  ;;  %v878_v39 = vunpack.c.l.bf16 %v2138_v27  ;;  %v998_v28 = vadd.s32 4294967280, %v2766_v49 }
 0x346   : > { %2143 = vpow.bf16 %v852_v10  ;;  %1153 = vmatpush1.bf16.msra.mxu0 %v2136_v8  ;;  %v1005_v8 = vadd.s32 4294967272, %v2766_v49  ;;  %v989_v10 = vsub.s32 %v2766_v49, %v2768_v6 }
 0x347   : > { %2145 = vpow.bf16 %v855_v29  ;;  %v922_v52 = vadd.f32 %v880_v38, %v879_v30  ;;  %v919_v53 = vadd.f32 %v878_v39, %v877_v36  ;;  %v994_v29 = vsub.s32 %v991_v25, %v2768_v6 }
 0x348   : > { %v1001_v38 = vsub.s32 %v998_v28, %v2768_v6  ;;  %v1012_v39 = vadd.s32 4294967264, %v2766_v49  ;;  %v1050_v25 = vsub.s32 %v1047_v2, %v2768_v6 }
 0x349   : > { %v2140_v54 = vpop.eup %2139  ;;  %923 = vadd.xlane.f32.xlu0 %v922_v52  ;;  %920 = vadd.xlane.f32.xlu1 %v919_v53 }
 0x34a   : > { %v2142_v56 = vpop.eup %2141  ;;  %v883_v43 = vunpack.c.h.bf16 %v2140_v54  ;;  %v881_v12 = vunpack.c.l.bf16 %v2140_v54 }
 0x34b   : > { %1154 = vmatprep.subr.bf16.mxu0 %v2142_v56  ;;  %v884_v13 = vunpack.c.h.bf16 %v2142_v56  ;;  %v882_v14 = vunpack.c.l.bf16 %v2142_v56 }
 0x34c   : > { %1155 = vmatpush1.bf16.msra.mxu0 %v2140_v54  ;;  %v1008_v54 = vsub.s32 %v1005_v8, %v2768_v6  ;;  %v1057_v8 = vsub.s32 %v1054_v21, %v2768_v6 }
 0x34d   : > { %v928_v31 = vadd.f32 %v884_v13, %v883_v43  ;;  %v925_v45 = vadd.f32 %v882_v14, %v881_v12  ;;  %v1019_v12 = vadd.s32 4294967256, %v2766_v49 }
 0x34f   : > { %929 = vadd.xlane.f32.xlu0 %v928_v31  ;;  %926 = vadd.xlane.f32.xlu1 %v925_v45  ;;  %v1015_v45 = vsub.s32 %v1012_v39, %v2768_v6 }
 0x351   : > { %v2144_v32 = vpop.eup %2143 }
 0x352   : > { %v2146_v34 = vpop.eup %2145  ;;  %v887_v37 = vunpack.c.h.bf16 %v2144_v32  ;;  %v885_v16 = vunpack.c.l.bf16 %v2144_v32 }
 0x353   : > { %1156 = vmatprep.subr.bf16.mxu0 %v2146_v34  ;;  %v888_v46 = vunpack.c.h.bf16 %v2146_v34  ;;  %v886_v33 = vunpack.c.l.bf16 %v2146_v34 }
 0x354   : > { %1157 = vmatpush1.bf16.msra.mxu0 %v2144_v32  ;;  %v1026_v32 = vadd.s32 4294967248, %v2766_v49 }
 0x355   : > { %v934_v51 = vadd.f32 %v888_v46, %v887_v37  ;;  %v931_v55 = vadd.f32 %v886_v33, %v885_v16  ;;  %v1033_v16 = vadd.s32 4294967240, %v2766_v49 }
 0x357   : > { %935 = vadd.xlane.f32.xlu0 %v934_v51  ;;  %932 = vadd.xlane.f32.xlu1 %v931_v55  ;;  %v1022_v51 = vsub.s32 %v1019_v12, %v2768_v6  ;;  %v1036_v41 = vsub.s32 %v1033_v16, %v2768_v6 }
 0x368   : > { %413 = vperm.xlu1 %2108, %v394_v57  }
 0x36c   : > { %418 = vperm.xlu1 %2108, %v395_v18  }
 0x36d   : > { %408 = vperm.xlu0 %2109, %v393_v19   ;;  %v1029_v19 = vsub.s32 %v1026_v32, %v2768_v6 }
 0x370   : > { %423 = vperm.xlu1 %2108, %v396_v22  }
 0x374   : > { %428 = vperm.xlu1 %2108, %v397_v62  }
 0x378   : > { %433 = vperm.xlu1 %2108, %v398_v63  }
 0x37c   : > { %438 = vperm.xlu1 %2108, %v399_v4  }
 0x380   : > { %443 = vperm.xlu1 %2108, %v400_v47  }
 0x3ac   : > { %v891_v17 = vpop.xlane.xlu1 %890  ;;  %v894_v23 = vpop.xlane.xlu0 %893 }
 0x3ad   : > { %2147 = vrcp.f32 %v891_v17  ;;  %v1043_v17 = vsub.s32 %v1040_v20, %v2768_v6 }
 0x3ae   : > { %2149 = vrcp.f32 %v894_v23 }
 0x3b6   : > { %v897_v48 = vpop.xlane.xlu1 %896  ;;  %v900_v50 = vpop.xlane.xlu0 %899 }
 0x3b7   : > { %2151 = vrcp.f32 %v897_v48  ;;  %v2148_v27 = vpop.eup %2147  ;;  %v1061_v48 = vadd.s32 4294967208, %v2766_v49 }
 0x3b8   : > { %2153 = vrcp.f32 %v900_v50  ;;  %v2150_v36 = vpop.eup %2149  ;;  %v990_v56 = vrot.slane %v2148_v27, %v989_v10  ;;  %v1068_v27 = vadd.s32 4294967200, %v2766_v49 }
 0x3b9   : > { %v995_v43 = vrot.slane %v2150_v36, %v994_v29  ;;  %v1064_v29 = vsub.s32 %v1061_v48, %v2768_v6 }
 0x3bb   : > { %v997_v46 = vsel %vm996_vm4, %v995_v43, %v990_v56  ;;  %v1071_v43 = vsub.s32 %v1068_v27, %v2768_v6 }
 0x3be   : > { %v903_v24 = vpop.xlane.xlu1 %902  ;;  %v906_v26 = vpop.xlane.xlu0 %905 }
 0x3bf   : > { %2155 = vrcp.f32 %v903_v24 }
 0x3c0   : > { %2157 = vrcp.f32 %v906_v26 }
 0x3c1   : > { %v2152_v53 = vpop.eup %2151 }
 0x3c2   : > { %v2154_v14 = vpop.eup %2153  ;;  %v1002_v31 = vrot.slane %v2152_v53, %v1001_v38 }
 0x3c3   : > { %v1009_v33 = vrot.slane %v2154_v14, %v1008_v54 }
 0x3c4   : > { %v1004_v59 = vsel %vm1003_vm5, %v1002_v31, %v997_v46 }
 0x3c5   : > { %v1011_v44 = vsel %vm1010_vm6, %v1009_v33, %v1004_v59 }
 0x3c6   : > { %v909_v7 = vpop.xlane.xlu1 %908  ;;  %v912_v30 = vpop.xlane.xlu0 %911 }
 0x3c7   : > { %2159 = vrcp.f32 %v909_v7 }
 0x3c8   : > { %2161 = vrcp.f32 %v912_v30 }
 0x3c9   : > { %v2156_v37 = vpop.eup %2155 }
 0x3ca   : > { %v2158_v57 = vpop.eup %2157  ;;  %v1016_v18 = vrot.slane %v2156_v37, %v1015_v45 }
 0x3cb   : > { %v1023_v63 = vrot.slane %v2158_v57, %v1022_v51 }
 0x3cc   : > { %v1018_v11 = vsel %vm1017_vm7, %v1016_v18, %v1011_v44 }
 0x3cd   : > { %v1025_v50 = vsel %vm1024_vm8, %v1023_v63, %v1018_v11 }
 0x3ce   : > { %v915_v52 = vpop.xlane.xlu1 %914  ;;  %v918_v13 = vpop.xlane.xlu0 %917 }
 0x3cf   : > { %2163 = vrcp.f32 %v915_v52  ;;  %v1075_v52 = vadd.s32 4294967192, %v2766_v49 }
 0x3d0   : > { %2165 = vrcp.f32 %v918_v13  ;;  %v1082_v13 = vadd.s32 4294967184, %v2766_v49 }
 0x3d1   : > { %v2160_v22 = vpop.eup %2159  ;;  %v1078_v32 = vsub.s32 %v1075_v52, %v2768_v6 }
 0x3d2   : > { %v2162_v5 = vpop.eup %2161  ;;  %v1030_v47 = vrot.slane %v2160_v22, %v1029_v19  ;;  %v1085_v33 = vsub.s32 %v1082_v13, %v2768_v6 }
 0x3d3   : > { %v1037_v24 = vrot.slane %v2162_v5, %v1036_v41 }
 0x3d4   : > { %v1032_v28 = vsel %vm1031_vm9, %v1030_v47, %v1025_v50 }
 0x3d5   : > { %v1039_v38 = vsel %vm1038_vm10, %v1037_v24, %v1032_v28 }
 0x3d6   : > { %v921_v34 = vpop.xlane.xlu1 %920  ;;  %v924_v55 = vpop.xlane.xlu0 %923 }
 0x3d7   : > { %2167 = vrcp.f32 %v921_v34  ;;  %v1089_v34 = vadd.s32 4294967176, %v2766_v49 }
 0x3d8   : > { %2169 = vrcp.f32 %v924_v55 }
 0x3d9   : > { %v2164_v23 = vpop.eup %2163  ;;  %v1092_v59 = vsub.s32 %v1089_v34, %v2768_v6 }
 0x3da   : > { %v2166_v26 = vpop.eup %2165  ;;  %v1044_v7 = vrot.slane %v2164_v23, %v1043_v17 }
 0x3db   : > { %v1051_v39 = vrot.slane %v2166_v26, %v1050_v25 }
 0x3dc   : > { %v927_v62 = vpop.xlane.xlu1 %926  ;;  %v930_v4 = vpop.xlane.xlu0 %929  ;;  %v1046_v54 = vsel %vm1045_vm11, %v1044_v7, %v1039_v38 }
 0x3dd   : > { %2171 = vrcp.f32 %v927_v62  ;;  %v1053_v31 = vsel %vm1052_vm12, %v1051_v39, %v1046_v54  ;;  %v520_v62 = vadd.f32 %v2692_v61, %v2764_v15  ;;  %v1126_v39 = vld [vmem:[#allocation3 + $0x10] sm:$0xff]  ;;  %v1127_v54 = vld [vmem:[#allocation3 + $0x18] sm:$0xff] }
 0x3de   : > { %2173 = vrcp.f32 %v930_v4 }
 0x3e1   : > { %v2168_v10 = vpop.eup %2167 }
 0x3e2   : > { %v2170_v53 = vpop.eup %2169  ;;  %v1058_v56 = vrot.slane %v2168_v10, %v1057_v8 }
 0x3e3   : > { %v1065_v45 = vrot.slane %v2170_v53, %v1064_v29 }
 0x3e4   : > { %v933_v30 = vpop.xlane.xlu1 %932  ;;  %v936_v36 = vpop.xlane.xlu0 %935  ;;  %v1060_v16 = vsel %vm1059_vm13, %v1058_v56, %v1053_v31 }
 0x3e5   : > { %2175 = vrcp.f32 %v933_v30  ;;  %v1067_v55 = vsel %vm1066_vm14, %v1065_v45, %v1060_v16  ;;  %v1130_v45 = vld [vmem:[#allocation3 + $0x30] sm:$0xff] }
 0x3e6   : > { %2177 = vrcp.f32 %v936_v36  ;;  %v1124_v36 = vld [vmem:[#allocation3] sm:$0xff] }
 0x3e7   : > { %v2172_v12 = vpop.eup %2171 }
 0x3e8   : > { %v414_v14 = vpop.permute.xlu1 %413  ;;  %v2174_v37 = vpop.eup %2173  ;;  %v1072_v46 = vrot.slane %v2172_v12, %v1071_v43 }
 0x3e9   : > { %v1079_v57 = vrot.slane %v2174_v37, %v1078_v32  ;;  %v528_v4 = vadd.f32 %v2734_v60, %v414_v14  ;;  %v1129_v14 = vld [vmem:[#allocation3 + $0x28] sm:$0xff]  ;;  %v1131_v37 = vld [vmem:[#allocation3 + $0x38] sm:$0xff] }
 0x3ea   : > { %v1074_v18 = vsel %vm1073_vm15, %v1072_v46, %v1067_v55 }
 0x3eb   : > { %v1081_v44 = vsel %vm1080_vm0, %v1079_v57, %v1074_v18  ;;  %v1132_v57 = vld [vmem:[#allocation3 + $0x40] sm:$0xff] }
 0x3ec   : > { %v419_v51 = vpop.permute.xlu1 %418  ;;  %v409_v20 = vpop.permute.xlu0 %408 }
 0x3ed   : > { %v531_v5 = vadd.f32 %v2742_v40, %v419_v51  ;;  %v523_v11 = vadd.f32 %v2729_v58, %v409_v20 }
 0x3ef   : > { %v2176_v19 = vpop.eup %2175 }
 0x3f0   : > { %v2178_v22 = vpop.eup %2177  ;;  %v1086_v41 = vrot.slane %v2176_v19, %v1085_v33  ;;  %v424_v49 = vpop.permute.xlu1 %423  ;;  %v1134_v19 = vld [vmem:[#allocation3 + $0x50] sm:$0xff] }
 0x3f1   : > { %v1093_v63 = vrot.slane %v2178_v22, %v1092_v59  ;;  %v536_v17 = vadd.f32 %v2747_v42, %v424_v49  ;;  %v1133_v59 = vld [vmem:[#allocation3 + $0x48] sm:$0xff] }
 0x3f2   : > { %v1088_v2 = vsel %vm1087_vm1, %v1086_v41, %v1081_v44  ;;  %v1135_v41 = vld [vmem:[#allocation3 + $0x58] sm:$0xff] }
 0x3f3   : > { %v1095_v47 = vsel %vm1094_vm3, %v1093_v63, %v1088_v2 }
 0x3f4   : > { %v1112_v21 = vmul.f32 %v1095_v47, %v528_v4  ;;  %v1113_v23 = vmul.f32 %v1095_v47, %v531_v5  ;;  %v1110_v48 = vmul.f32 %v1095_v47, %v520_v62  ;;  %v1111_v50 = vmul.f32 %v1095_v47, %v523_v11  ;;  %v429_v24 = vpop.permute.xlu1 %428  ;;  %v1136_v4 = vld [vmem:[#allocation3 + $0x60] sm:$0xff]  ;;  %v1137_v5 = vld [vmem:[#allocation3 + $0x68] sm:$0xff] }
 0x3f5   : > { %v539_v25 = vadd.f32 %v2752_v0, %v429_v24  ;;  %v1114_v26 = vmul.f32 %v1095_v47, %v536_v17 }
 0x3f6   : > { %v1119_v61 = vpack.c.bf16 %v1111_v50, %v1110_v48  ;;  %v1120_v15 = vpack.c.bf16 %v1113_v23, %v1112_v21  ;;  %v1139_v23 = vld [vmem:[#allocation3 + $0x78] sm:$0xff] }
 0x3f7   : > { %v1115_v28 = vmul.f32 %v1095_v47, %v539_v25 }
 0x3f8   : > { %v434_v7 = vpop.permute.xlu1 %433  ;;  %1175 = vmatmul.mubr.bf16.vlgmr.msra.gmra.mrb[16].mxu0 %v1119_v61 }
 0x3f9   : > { %1184 = vmatprep.mubr.bf16.mxu0 %v2334_v35  ;;  %v1121_v60 = vpack.c.bf16 %v1115_v28, %v1114_v26  ;;  %v544_v58 = vadd.f32 %v2754_v3, %v434_v7  ;;  %v1141_v26 = vld [vmem:[#allocation3 + $0x88] sm:$0x1] }
 0x3fb   : > { %v1116_v8 = vmul.f32 %v1095_v47, %v544_v58 }
 0x3fc   : > { %v439_v40 = vpop.permute.xlu1 %438 }
 0x3fd   : > { %v547_v42 = vadd.f32 %v2759_v9, %v439_v40  ;;  %v1125_v9 = vld [vmem:[#allocation3 + $0x8] sm:$0xff] }
 0x3ff   : > { %v1117_v27 = vmul.f32 %v1095_v47, %v547_v42 }
 0x400   : > { %1185 = vmatmul.mubr.bf16.gmra.mrb[20].mxu0 %v1120_v15  ;;  %v444_v10 = vpop.permute.xlu1 %443  ;;  %v1140_v15 = vld [vmem:[#allocation3 + $0x80] sm:$0x1] }
 0x401   : > { %1194 = vmatprep.mubr.bf16.mxu0 %v2334_v35  ;;  %v1122_v0 = vpack.c.bf16 %v1117_v27, %v1116_v8  ;;  %v552_v29 = vadd.f32 %v2568_v1, %v444_v10 }
 0x403   : > { %v1118_v30 = vmul.f32 %v1095_v47, %v552_v29  ;;  %v1138_v47 = vld [vmem:[#allocation3 + $0x70] sm:$0xff] }
 0x405   : > { %v1123_v3 = vpack.c.bf16 %v1118_v30, %v1118_v30 }
 0x408   : > { %1195 = vmatmul.mubr.bf16.gmra.mrb[24].mxu0 %v1121_v60 }
 0x409   : > { %1204 = vmatprep.mubr.bf16.mxu0 %v2334_v35 }
 0x410   : > { %1205 = vmatmul.mubr.bf16.gmra.mrb[28].mxu0 %v1122_v0 }
 0x411   : > { %1214 = vmatprep.mubr.bf16.mxu0 %v2334_v35  ;;  %v1128_v35 = vld [vmem:[#allocation3 + $0x20] sm:$0xff] }
 0x418   : > { %1215 = vmatmul.mubr.bf16.gmra.mrb[32].mxu0 %v1123_v3 }
 0x4cb   : > { %v1176_v38 = vpop.f32.mrb[16].mxu0 }
 0x4cc   : > { %v1223_v52 = vadd.f32 %v1176_v38, %v1124_v36  ;;  %v1178_v53 = vpop.f32.mrb[17].mxu0 }
 0x4cd   : > { %v1224_v56 = vadd.f32 %v1178_v53, %v1125_v9  ;;  %v1180_v43 = vpop.f32.mrb[18].mxu0 }
 0x4ce   : > { %1241 = vst [vmem:[#allocation3] sm:$0xff] %v1223_v52  ;;  %v1225_v12 = vadd.f32 %v1180_v43, %v1126_v39  ;;  %v1182_v13 = vpop.f32.mrb[19].mxu0 }
 0x4cf   : > { %1242 = vst [vmem:[#allocation3 + $0x8] sm:$0xff] %v1224_v56  ;;  %v1226_v1 = vadd.f32 %v1182_v13, %v1127_v54 }
 0x4d0   : > { %1243 = vst [vmem:[#allocation3 + $0x10] sm:$0xff] %v1225_v12 }
 0x4d1   : > { %1244 = vst [vmem:[#allocation3 + $0x18] sm:$0xff] %v1226_v1 }
 0x4d3   : > { %v1186_v31 = vpop.f32.mrb[20].mxu0 }
 0x4d4   : > { %v1227_v32 = vadd.f32 %v1186_v31, %v1128_v35  ;;  %v1188_v34 = vpop.f32.mrb[21].mxu0 }
 0x4d5   : > { %v1228_v16 = vadd.f32 %v1188_v34, %v1129_v14  ;;  %v1190_v46 = vpop.f32.mrb[22].mxu0 }
 0x4d6   : > { %1245 = vst [vmem:[#allocation3 + $0x20] sm:$0xff] %v1227_v32  ;;  %v1229_v33 = vadd.f32 %v1190_v46, %v1130_v45  ;;  %v1192_v51 = vpop.f32.mrb[23].mxu0 }
 0x4d7   : > { %1246 = vst [vmem:[#allocation3 + $0x28] sm:$0xff] %v1228_v16  ;;  %v1230_v55 = vadd.f32 %v1192_v51, %v1131_v37 }
 0x4d8   : > { %1247 = vst [vmem:[#allocation3 + $0x30] sm:$0xff] %v1229_v33 }
 0x4d9   : > { %1248 = vst [vmem:[#allocation3 + $0x38] sm:$0xff] %v1230_v55 }
 0x4db   : > { %v1196_v18 = vpop.f32.mrb[24].mxu0 }
 0x4dc   : > { %v1231_v20 = vadd.f32 %v1196_v18, %v1132_v57  ;;  %v1198_v22 = vpop.f32.mrb[25].mxu0 }
 0x4dd   : > { %v1232_v49 = vadd.f32 %v1198_v22, %v1133_v59  ;;  %v1200_v62 = vpop.f32.mrb[26].mxu0 }
 0x4de   : > { %1249 = vst [vmem:[#allocation3 + $0x40] sm:$0xff] %v1231_v20  ;;  %v1233_v44 = vadd.f32 %v1200_v62, %v1134_v19  ;;  %v1202_v63 = vpop.f32.mrb[27].mxu0 }
 0x4df   : > { %1250 = vst [vmem:[#allocation3 + $0x48] sm:$0xff] %v1232_v49  ;;  %v1234_v2 = vadd.f32 %v1202_v63, %v1135_v41 }
 0x4e0   : > { %1251 = vst [vmem:[#allocation3 + $0x50] sm:$0xff] %v1233_v44 }
 0x4e1   : > { %1252 = vst [vmem:[#allocation3 + $0x58] sm:$0xff] %v1234_v2 }
 0x4e3   : > { %v1206_v11 = vpop.f32.mrb[28].mxu0 }
 0x4e4   : > { %v1235_v17 = vadd.f32 %v1206_v11, %v1136_v4  ;;  %v1208_v21 = vpop.f32.mrb[29].mxu0 }
 0x4e5   : > { %v1236_v48 = vadd.f32 %v1208_v21, %v1137_v5  ;;  %v1210_v50 = vpop.f32.mrb[30].mxu0 }
 0x4e6   : > { %1253 = vst [vmem:[#allocation3 + $0x60] sm:$0xff] %v1235_v17  ;;  %v1237_v24 = vadd.f32 %v1210_v50, %v1138_v47  ;;  %v1212_v25 = vpop.f32.mrb[31].mxu0 }
 0x4e7   : > { %1254 = vst [vmem:[#allocation3 + $0x68] sm:$0xff] %v1236_v48  ;;  %v1238_v61 = vadd.f32 %v1212_v25, %v1139_v23 }
 0x4e8   : > { %1255 = vst [vmem:[#allocation3 + $0x70] sm:$0xff] %v1237_v24 }
 0x4e9   : > { %1256 = vst [vmem:[#allocation3 + $0x78] sm:$0xff] %v1238_v61  ;;  %1262 = sbr.rel (%p1947_p9) target bundleno = 1909 (0x775), region = 48 }
 0x4eb   : > { %v1216_v28 = vpop.f32.mrb[32].mxu0 }
 0x4ec   : > { %v1239_v7 = vadd.f32 %v1216_v28, %v1140_v15  ;;  %v1218_v60 = vpop.f32.mrb[33].mxu0 }
 0x4ed   : > { %v1240_v58 = vadd.f32 %v1218_v60, %v1141_v26  ;;  %v1220_v40 = vpop.f32.mrb[34].mxu0 }
 0x4ee   : > { %1257 = vst [vmem:[#allocation3 + $0x80] sm:$0x1] %v1239_v7  ;;  %v1221_v42 = vpop.f32.mrb[35].mxu0 }
 0x4ef   : > { %1258 = vst [vmem:[#allocation3 + $0x88] sm:$0x1] %v1240_v58 }
 0x4f0   : > { %v2335_v27 = vmov 0   ;;  %v2336_v10 = vmov 1   ;;  %v1305_v3 = vsub.s32 0, %v2768_v6  ;;  %v1280_v36 = vld [vmem:[#allocation3 + $0x8] sm:$0xff]  ;;  %v1282_v9 = vld [vmem:[#allocation3 + $0x18] sm:$0xff]  ;;  %v1279_v43 = vld [vmem:[#allocation3] sm:$0xff] }
 0x4f1   : > { %1471 = vmatprep.mubr.bf16.mxu0 %v2335_v27  ;;  %1491 = vmatprep.mubr.bf16.mxu1 %v2335_v27  ;;  %v1284_v38 = vld [vmem:[#allocation3 + $0x28] sm:$0xff]  ;;  %v1286_v39 = vld [vmem:[#allocation3 + $0x38] sm:$0xff]  ;;  %v2834_v6 = vld [vmem:[%s3234_s3] sm:$0xff] }
 0x4f2   : > { %2179 = vset.pattern.permute.xlu0 %v2336_v10  ;;  %2180 = vset.pattern.permute.xlu1 %v2336_v10  ;;  %v1288_v52 = vld [vmem:[#allocation3 + $0x48] sm:$0xff]  ;;  %v2824_v54 = vld [vmem:[%s2496_s14 + $0x8] sm:$0xff]  ;;  %v2839_v35 = vld [vmem:[%s3234_s3 + $0x20] sm:$0xff] }
 0x4f3   : > { %v2827_v56 = vld [vmem:[%s2496_s14 + $0x18] sm:$0xff]  ;;  %v1290_v12 = vld [vmem:[#allocation3 + $0x58] sm:$0xff]  ;;  %v2842_v31 = vld [vmem:[%s2496_s14] sm:$0xff]  ;;  %1369 = vperm.xlu0 %2179, %v2834_v6   ;;  %1389 = vperm.xlu1 %2180, %v2839_v35  }
 0x4f4   : > { %v1292_v1 = vld [vmem:[#allocation3 + $0x68] sm:$0xff]  ;;  %v1281_v45 = vld [vmem:[#allocation3 + $0x10] sm:$0xff]  ;;  %v2845_v32 = vld [vmem:[%s2496_s14 + $0x28] sm:$0xff] }
 0x4f5   : > { %v1295_v29 = vld [vmem:[#allocation3 + $0x80] sm:$0x1]  ;;  %v2848_v34 = vld [vmem:[%s2496_s14 + $0x38] sm:$0xff]  ;;  %v1285_v55 = vld [vmem:[#allocation3 + $0x30] sm:$0xff] }
 0x4f6   : > { %v1296_v8 = vld [vmem:[#allocation3 + $0x88] sm:$0x1]  ;;  %v1297_v30 = vadd.f32 1e-09, %v1295_v29  ;;  %v1283_v51 = vld [vmem:[#allocation3 + $0x20] sm:$0xff]  ;;  %v2860_v57 = vld [vmem:[%s3234_s3 + $0x8] sm:$0xff] }
 0x4f7   : > { %v1298_v0 = vadd.f32 1e-09, %v1296_v8  ;;  %v2863_v59 = vld [vmem:[%s2496_s14 + $0x10] sm:$0xff]  ;;  %v2867_v19 = vld [vmem:[%s2496_s14 + $0x48] sm:$0xff]  ;;  %v2884_v4 = vld [vmem:[%s2496_s14 + $0x20] sm:$0xff]  ;;  %1374 = vperm.xlu0 %2179, %v2860_v57  }
 0x4f8   : > { %v2877_v49 = vld [vmem:[%s3234_s3 + $0x28] sm:$0xff]  ;;  %v2887_v5 = vld [vmem:[%s2496_s14 + $0x30] sm:$0xff]  ;;  %v2890_v11 = vld [vmem:[%s2496_s14 + $0x58] sm:$0xff] }
 0x4f9   : > { %2189 = vrcp.f32 %v1298_v0  ;;  %v1287_v48 = vld [vmem:[#allocation3 + $0x40] sm:$0xff]  ;;  %v1289_v50 = vld [vmem:[#allocation3 + $0x50] sm:$0xff]  ;;  %v1294_v26 = vld [vmem:[#allocation3 + $0x78] sm:$0xff]  ;;  %1394 = vperm.xlu1 %2180, %v2877_v49  }
 0x4fa   : > { %2191 = vrcp.f32 %v1297_v30  ;;  %v2904_v28 = vld [vmem:[%s3234_s3 + $0x10] sm:$0xff]  ;;  %v2910_v42 = vld [vmem:[%s2496_s14 + $0x40] sm:$0xff] }
 0x4fb   : > { %v2913_v8 = vld [vmem:[%s2496_s14 + $0x50] sm:$0xff]  ;;  %1379 = vperm.xlu0 %2179, %v2904_v28  }
 0x4fc   : > { %v1291_v0 = vld [vmem:[#allocation3 + $0x60] sm:$0xff] }
 0x503   : > { %v2190_v53 = vpop.eup %2189 }
 0x504   : > { %v2829_v13 = vrot.slane %v2190_v53, %v1305_v3  ;;  %v2192_v14 = vpop.eup %2191  ;;  %v2928_v53 = vld [vmem:[%s3234_s3 + $0x30] sm:$0xff] }
 0x505   : > { %v2854_v46 = vrot.slane %v2192_v14, %v1305_v3  ;;  %v2918_v3 = vld [vmem:[%s2496_s14 + $0x68] sm:$0xff]  ;;  %v2936_v14 = vld [vmem:[%s3234_s3 + $0x18] sm:$0xff]  ;;  %1399 = vperm.xlu1 %2180, %v2928_v53  }
 0x506   : > { %v1312_v37 = vmul.f32 %v2829_v13, %v1280_v36  ;;  %v1314_v16 = vmul.f32 %v2829_v13, %v1282_v9  ;;  %v1316_v33 = vmul.f32 %v2829_v13, %v1284_v38  ;;  %v1318_v18 = vmul.f32 %v2829_v13, %v1286_v39  ;;  %3244 = vst [vmem:[#allocation10_spill] sm:$0xff] %v2918_v3  ;;  %v2921_v36 = vld [vmem:[%s2496_s14 + $0x78] sm:$0xff]  ;;  %v1293_v9 = vld [vmem:[#allocation3 + $0x70] sm:$0xff] }
 0x507   : > { %v1320_v20 = vmul.f32 %v2829_v13, %v1288_v52  ;;  %v1322_v22 = vmul.f32 %v2829_v13, %v1290_v12  ;;  %v2872_v41 = vmul.f32 %v2829_v13, %v1292_v1  ;;  %v1311_v63 = vmul.f32 %v2854_v46, %v1279_v43  ;;  %1384 = vperm.xlu0 %2179, %v2936_v14  }
 0x508   : > { %v1336_v62 = vsub.f32 %v2824_v54, %v1312_v37  ;;  %v1338_v44 = vsub.f32 %v2827_v56, %v1314_v16  ;;  %v1313_v2 = vmul.f32 %v2854_v46, %v1281_v45  ;;  %v1340_v47 = vsub.f32 %v2845_v32, %v1316_v33  ;;  %v2942_v37 = vld [vmem:[%s2496_s14 + $0x60] sm:$0xff]  ;;  %v2945_v16 = vld [vmem:[%s2496_s14 + $0x70] sm:$0xff] }
 0x509   : > { %v1342_v17 = vsub.f32 %v2848_v34, %v1318_v18  ;;  %v1315_v21 = vmul.f32 %v2854_v46, %v1283_v51  ;;  %v1317_v23 = vmul.f32 %v2854_v46, %v1285_v55  ;;  %v1335_v25 = vsub.f32 %v2842_v31, %v1311_v63  ;;  %v2953_v51 = vld [vmem:[%s3234_s3 + $0x38] sm:$0xff]  ;;  %v2188_v63 = vld [vmem:[%s3233_s2 + $0x20] sm:$0xff]  }
 0x50a   : > { %v1352_v24 = vpack.c.bf16 %v1338_v44, %v1336_v62  ;;  %v1337_v61 = vsub.f32 %v2863_v59, %v1313_v2  ;;  %v1344_v15 = vsub.f32 %v2867_v19, %v1320_v20  ;;  %v1346_v40 = vsub.f32 %v2890_v11, %v1322_v22  ;;  %1404 = vperm.xlu1 %2180, %v2953_v51   ;;  %v2186_v62 = vld [vmem:[%s3233_s2 + $0x18] sm:$0xff]   ;;  %v2187_v44 = vld [vmem:[%s3233_s2 + $0x10] sm:$0xff]  }
 0x50b   : > { %v1354_v7 = vpack.c.bf16 %v1342_v17, %v1340_v47  ;;  %v1339_v60 = vsub.f32 %v2884_v4, %v1315_v21  ;;  %v1341_v58 = vsub.f32 %v2887_v5, %v1317_v23  ;;  %v1319_v29 = vmul.f32 %v2854_v46, %v1287_v48 }
 0x50c   : > { %1439 = vmatprep.subr.bf16.mxu0 %v1352_v24  ;;  %2008 = vmatprep.subr.bf16.mxu1 %v1352_v24  ;;  %v1351_v10 = vpack.c.bf16 %v1337_v61, %v1335_v25  ;;  %v1321_v30 = vmul.f32 %v2854_v46, %v1289_v50  ;;  %v1356_v39 = vpack.c.bf16 %v1346_v40, %v1344_v15  ;;  %v2337_v2 = vmov 2  }
 0x50d   : > { %v1353_v38 = vpack.c.bf16 %v1341_v58, %v1339_v60  ;;  %v1326_v52 = vmul.f32 %v2829_v13, %v1294_v26  ;;  %v1343_v43 = vsub.f32 %v2910_v42, %v1319_v29  ;;  %v1323_v1 = vmul.f32 %v2854_v46, %v1291_v0  ;;  %2182 = vset.pattern.permute.xlu0 %v2337_v2 }
 0x50e   : > { %1440 = vmatpush1.bf16.msra.mxu0 %v1351_v10  ;;  %2012 = vmatpush1.bf16.msra.mxu1 %v1351_v10  ;;  %v1345_v12 = vsub.f32 %v2913_v8, %v1321_v30  ;;  %v1348_v13 = vsub.f32 %v2918_v3, %v2872_v41  ;;  %v1325_v33 = vmul.f32 %v2854_v46, %v1293_v9  ;;  %v2185_v41 = vld [vmem:[%s3233_s2 + $0x8] sm:$0xff]  }
 0x50f   : > { %1441 = vmatprep.subr.bf16.mxu0 %v1354_v7  ;;  %2009 = vmatprep.subr.bf16.mxu1 %v1354_v7  ;;  %v1350_v45 = vsub.f32 %v2921_v36, %v1326_v52  ;;  %v1347_v18 = vsub.f32 %v2942_v37, %v1323_v1 }
 0x510   : > { %v1355_v55 = vpack.c.bf16 %v1345_v12, %v1343_v43  ;;  %v1349_v20 = vsub.f32 %v2945_v16, %v1325_v33  ;;  %2181 = vset.pattern.permute.xlu1 %v2337_v2 }
 0x511   : > { %v1358_v22 = vpack.c.bf16 %v1350_v45, %v1348_v13 }
 0x512   : > { %1442 = vmatpush1.bf16.msra.mxu0 %v1353_v38  ;;  %2013 = vmatpush1.bf16.msra.mxu1 %v1353_v38  ;;  %v1357_v46 = vpack.c.bf16 %v1349_v20, %v1347_v18 }
 0x513   : > { %1443 = vmatprep.subr.bf16.mxu0 %v1356_v39  ;;  %2010 = vmatprep.subr.bf16.mxu1 %v1356_v39 }
 0x516   : > { %1444 = vmatpush1.bf16.msra.mxu0 %v1355_v55  ;;  %2014 = vmatpush1.bf16.msra.mxu1 %v1355_v55 }
 0x517   : > { %1445 = vmatprep.subr.bf16.mxu0 %v1358_v22  ;;  %2011 = vmatprep.subr.bf16.mxu1 %v1358_v22 }
 0x51a   : > { %1446 = vmatpush1.bf16.msra.mxu0 %v1357_v46  ;;  %2015 = vmatpush1.bf16.msra.mxu1 %v1357_v46 }
 0x51d   : > { %1952 = vmatmul.mubr.msk.bf16.vlgmr.msra.gmra.mrb[0].mxu0 %vm469_vm2, %v2185_v41  ;;  %1954 = vmatmul.mubr.msk.bf16.vlgmr.msra.gmra.mrb[0].mxu1 %vm469_vm2, %v2186_v62 }
 0x51e   : > { %1481 = vmatprep.mubr.bf16.mxu0 %v2335_v27  ;;  %1501 = vmatprep.mubr.bf16.mxu1 %v2335_v27 }
 0x525   : > { %1953 = vmatmul.mubr.msk.bf16.gmra.mrb[4].mxu0 %vm469_vm2, %v2187_v44  ;;  %1955 = vmatmul.mubr.msk.bf16.gmra.mrb[4].mxu1 %vm469_vm2, %v2188_v63 }
 0x572   : > { %v1370_v47 = vpop.permute.xlu0 %1369  ;;  %v1390_v17 = vpop.permute.xlu1 %1389 }
 0x576   : > { %v1375_v21 = vpop.permute.xlu0 %1374 }
 0x578   : > { %v1395_v23 = vpop.permute.xlu1 %1394 }
 0x57a   : > { %v1380_v27 = vpop.permute.xlu0 %1379 }
 0x584   : > { %v1400_v39 = vpop.permute.xlu1 %1399 }
 0x586   : > { %v1385_v52 = vpop.permute.xlu0 %1384 }
 0x5f0   : > { %v1473_v48 = vpop.f32.mrb[0].mxu0  ;;  %v1493_v50 = vpop.f32.mrb[0].mxu1 }
 0x5f1   : > { %v2976_v24 = vadd.f32 %v1473_v48, %v1370_v47  ;;  %v1475_v25 = vpop.f32.mrb[1].mxu0  ;;  %v1495_v61 = vpop.f32.mrb[1].mxu1  ;;  %v2980_v26 = vadd.f32 %v1493_v50, %v1390_v17 }
 0x5f2   : > { %v2978_v15 = vadd.f32 %v1475_v25, %v1370_v47  ;;  %v1477_v7 = vpop.f32.mrb[2].mxu0  ;;  %v2982_v60 = vadd.f32 %v1495_v61, %v1390_v17  ;;  %v1497_v58 = vpop.f32.mrb[2].mxu1 }
 0x5f3   : > { %v2984_v40 = vadd.f32 %v1477_v7, %v1375_v21  ;;  %v1479_v0 = vpop.f32.mrb[3].mxu0  ;;  %v1499_v10 = vpop.f32.mrb[3].mxu1  ;;  %v2994_v43 = vadd.f32 %v1497_v58, %v1395_v23 }
 0x5f4   : > { %v2986_v29 = vadd.f32 %v1479_v0, %v1375_v21  ;;  %v1512_v30 = vadd.f32 %v2978_v15, %v2976_v24  ;;  %v1524_v38 = vadd.f32 %v2982_v60, %v2980_v26  ;;  %v2996_v12 = vadd.f32 %v1499_v10, %v1395_v23  ;;  %v1405_v21 = vpop.permute.xlu1 %1404 }
 0x5f6   : > { %1513 = vadd.xlane.f32.xlu0 %v1512_v30  ;;  %v1515_v9 = vadd.f32 %v2986_v29, %v2984_v40  ;;  %v1527_v44 = vadd.f32 %v2996_v12, %v2994_v43 }
 0x5f8   : > { %v1483_v1 = vpop.f32.mrb[4].mxu0  ;;  %v1503_v13 = vpop.f32.mrb[4].mxu1  ;;  %1516 = vadd.xlane.f32.xlu1 %v1515_v9 }
 0x5f9   : > { %v2998_v45 = vadd.f32 %v1483_v1, %v1380_v27  ;;  %v1485_v33 = vpop.f32.mrb[5].mxu0  ;;  %v1505_v55 = vpop.f32.mrb[5].mxu1  ;;  %v3000_v46 = vadd.f32 %v1503_v13, %v1400_v39 }
 0x5fa   : > { %v1486_v18 = vadd.f32 %v1485_v33, %v1380_v27  ;;  %v1487_v20 = vpop.f32.mrb[6].mxu0  ;;  %v1507_v22 = vpop.f32.mrb[6].mxu1  ;;  %1525 = vadd.xlane.f32.xlu0 %v1524_v38  ;;  %v1506_v63 = vadd.f32 %v1505_v55, %v1400_v39 }
 0x5fb   : > { %v1489_v41 = vpop.f32.mrb[7].mxu0  ;;  %v1509_v62 = vpop.f32.mrb[7].mxu1  ;;  %v3004_v2 = vadd.f32 %v1487_v20, %v1385_v52  ;;  %v3009_v23 = vadd.f32 %v1507_v22, %v1405_v21 }
 0x5fc   : > { %v3006_v47 = vadd.f32 %v1489_v41, %v1385_v52  ;;  %v1518_v17 = vadd.f32 %v1486_v18, %v2998_v45  ;;  %v3011_v27 = vadd.f32 %v1509_v62, %v1405_v21  ;;  %v1530_v50 = vadd.f32 %v1506_v63, %v3000_v46 }
 0x5fe   : > { %1519 = vadd.xlane.f32.xlu1 %v1518_v17  ;;  %1528 = vadd.xlane.f32.xlu0 %v1527_v44  ;;  %v1521_v48 = vadd.f32 %v3006_v47, %v3004_v2  ;;  %v1533_v25 = vadd.f32 %v3011_v27, %v3009_v23 }
 0x602   : > { %1522 = vadd.xlane.f32.xlu1 %v1521_v48  ;;  %1531 = vadd.xlane.f32.xlu0 %v1530_v50 }
 0x606   : > { %1534 = vadd.xlane.f32.xlu0 %v1533_v25 }
 0x613   : > { %1653 = vperm.xlu1 %2181, %v2834_v6  }
 0x683   : > { %v1514_v61 = vpop.xlane.xlu0 %1513 }
 0x685   : > { %v1517_v7 = vpop.xlane.xlu1 %1516 }
 0x686   : > { %v1536_v30 = vadd.f32 %v1517_v7, %v1514_v61 }
 0x687   : > { %v1526_v58 = vpop.xlane.xlu0 %1525 }
 0x68b   : > { %v1520_v0 = vpop.xlane.xlu1 %1519  ;;  %v1529_v10 = vpop.xlane.xlu0 %1528 }
 0x68c   : > { %v1537_v9 = vadd.f32 %v1536_v30, %v1520_v0  ;;  %v1545_v52 = vadd.f32 %v1529_v10, %v1526_v58 }
 0x68f   : > { %v1523_v38 = vpop.xlane.xlu1 %1522  ;;  %v1532_v39 = vpop.xlane.xlu0 %1531 }
 0x690   : > { %v1538_v1 = vadd.f32 %v1537_v9, %v1523_v38  ;;  %v1546_v33 = vadd.f32 %v1545_v52, %v1532_v39 }
 0x692   : > { %v1539_v13 = vrot.slane %v1538_v1, 4 }
 0x693   : > { %v1535_v55 = vpop.xlane.xlu0 %1534 }
 0x694   : > { %v1540_v20 = vadd.f32 %v1539_v13, %v1538_v1  ;;  %v1547_v22 = vadd.f32 %v1546_v33, %v1535_v55 }
 0x696   : > { %v1541_v41 = vrot.slane %v1540_v20, 2  ;;  %v1548_v62 = vrot.slane %v1547_v22, 4 }
 0x698   : > { %v1542_v44 = vadd.f32 %v1541_v41, %v1540_v20  ;;  %v1549_v17 = vadd.f32 %v1548_v62, %v1547_v22 }
 0x69a   : > { %v1543_v21 = vrot.slane %v1542_v44, 1  ;;  %v1550_v48 = vrot.slane %v1549_v17, 2 }
 0x69c   : > { %v1544_v50 = vadd.f32 %v1543_v21, %v1542_v44  ;;  %v1551_v25 = vadd.f32 %v1550_v48, %v1549_v17 }
 0x69e   : > { %v1554_v3 = vmul.f32 0.00012207031, %v1544_v50  ;;  %v1552_v61 = vrot.slane %v1551_v25, 1 }
 0x6a0   : > { %v1553_v7 = vadd.f32 %v1552_v61, %v1551_v25  ;;  %v3020_v0 = vsub.f32 %v2984_v40, %v1554_v3  ;;  %v3023_v58 = vsub.f32 %v2986_v29, %v1554_v3  ;;  %v3026_v10 = vsub.f32 %v2976_v24, %v1554_v3 }
 0x6a1   : > { %v3029_v30 = vsub.f32 %v2978_v15, %v1554_v3  ;;  %v3040_v52 = vsub.f32 %v2998_v45, %v1554_v3  ;;  %v3042_v24 = vsub.f32 %v1486_v18, %v1554_v3 }
 0x6a2   : > { %v1555_v9 = vmul.f32 0.00012207031, %v1553_v7  ;;  %v1574_v38 = vmul.f32 %v3020_v0, %v3020_v0  ;;  %v1575_v39 = vmul.f32 %v3023_v58, %v3023_v58  ;;  %v1572_v40 = vmul.f32 %v3026_v10, %v3026_v10 }
 0x6a3   : > { %v1573_v29 = vmul.f32 %v3029_v30, %v3029_v30  ;;  %v1576_v21 = vmul.f32 %v3040_v52, %v3040_v52  ;;  %v1577_v48 = vmul.f32 %v3042_v24, %v3042_v24 }
 0x6a4   : > { %v1591_v15 = vadd.f32 %v1575_v39, %v1574_v38  ;;  %v3045_v1 = vsub.f32 %v2994_v43, %v1555_v9  ;;  %v3048_v13 = vsub.f32 %v2996_v12, %v1555_v9  ;;  %v3051_v33 = vsub.f32 %v2980_v26, %v1555_v9 }
 0x6a5   : > { %v1588_v55 = vadd.f32 %v1573_v29, %v1572_v40  ;;  %v3054_v20 = vsub.f32 %v2982_v60, %v1555_v9  ;;  %v3057_v22 = vsub.f32 %v3000_v46, %v1555_v9  ;;  %v3059_v45 = vsub.f32 %v1506_v63, %v1555_v9 }
 0x6a6   : > { %1592 = vadd.xlane.f32.xlu0 %v1591_v15  ;;  %v1582_v43 = vmul.f32 %v3045_v1, %v3045_v1  ;;  %v1583_v12 = vmul.f32 %v3048_v13, %v3048_v13  ;;  %v1580_v26 = vmul.f32 %v3051_v33, %v3051_v33  ;;  %v3072_v46 = vsub.f32 %v3004_v2, %v1554_v3 }
 0x6a7   : > { %1589 = vadd.xlane.f32.xlu1 %v1588_v55  ;;  %v1581_v60 = vmul.f32 %v3054_v20, %v3054_v20  ;;  %v1584_v18 = vmul.f32 %v3057_v22, %v3057_v22  ;;  %v1585_v41 = vmul.f32 %v3059_v45, %v3059_v45  ;;  %v3077_v62 = vsub.f32 %v3009_v23, %v1555_v9 }
 0x6a8   : > { %v1603_v63 = vadd.f32 %v1583_v12, %v1582_v43  ;;  %v3080_v44 = vsub.f32 %v3011_v27, %v1555_v9  ;;  %v3087_v2 = vsub.f32 %v3006_v47, %v1554_v3  ;;  %v1594_v25 = vadd.f32 %v1577_v48, %v1576_v21 }
 0x6a9   : > { %v1600_v17 = vadd.f32 %v1581_v60, %v1580_v26  ;;  %v1606_v50 = vadd.f32 %v1585_v41, %v1584_v18  ;;  %v1586_v23 = vmul.f32 %v3077_v62, %v3077_v62  ;;  %v1578_v61 = vmul.f32 %v3072_v46, %v3072_v46 }
 0x6aa   : > { %1604 = vadd.xlane.f32.xlu0 %v1603_v63  ;;  %v1587_v27 = vmul.f32 %v3080_v44, %v3080_v44  ;;  %v1579_v7 = vmul.f32 %v3087_v2, %v3087_v2  ;;  %v2338_v9 = vmov 3  }
 0x6ab   : > { %1601 = vadd.xlane.f32.xlu1 %v1600_v17 }
 0x6ac   : > { %v1609_v3 = vadd.f32 %v1587_v27, %v1586_v23  ;;  %v1597_v47 = vadd.f32 %v1579_v7, %v1578_v61 }
 0x6ae   : > { %1607 = vadd.xlane.f32.xlu0 %v1606_v50 }
 0x6af   : > { %1595 = vadd.xlane.f32.xlu1 %v1594_v25 }
 0x6b2   : > { %1610 = vadd.xlane.f32.xlu0 %v1609_v3 }
 0x6b3   : > { %1598 = vadd.xlane.f32.xlu1 %v1597_v47 }
 0x6c4   : > { %1661 = vperm.xlu1 %2181, %v2904_v28  }
 0x6c8   : > { %1665 = vperm.xlu1 %2181, %v2936_v14   ;;  %1657 = vperm.xlu0 %2182, %v2860_v57  }
 0x6cc   : > { %1669 = vperm.xlu1 %2181, %v2839_v35   ;;  %2184 = vset.pattern.permute.xlu0 %v2338_v9 }
 0x6cd   : > { %1709 = vperm.xlu0 %2184, %v2904_v28   ;;  %v3112_v28 = vpop.permute.xlu1 %1653 }
 0x6d0   : > { %1673 = vperm.xlu1 %2181, %v2877_v49  }
 0x6d1   : > { %1721 = vperm.xlu0 %2184, %v2877_v49  }
 0x6d4   : > { %1677 = vperm.xlu1 %2181, %v2928_v53  }
 0x6d5   : > { %1729 = vperm.xlu0 %2184, %v2953_v51  }
 0x6d8   : > { %1681 = vperm.xlu1 %2181, %v2953_v51  }
 0x6dc   : > { %2183 = vset.pattern.permute.xlu1 %v2338_v9 }
 0x6dd   : > { %1701 = vperm.xlu1 %2183, %v2834_v6  }
 0x6e1   : > { %1705 = vperm.xlu1 %2183, %v2860_v57  }
 0x6e5   : > { %1713 = vperm.xlu1 %2183, %v2936_v14  }
 0x6e9   : > { %1717 = vperm.xlu1 %2183, %v2839_v35  }
 0x6ed   : > { %1725 = vperm.xlu1 %2183, %v2928_v53  }
 0x733   : > { %v1593_v49 = vpop.xlane.xlu0 %1592 }
 0x734   : > { %v1590_v38 = vpop.xlane.xlu1 %1589 }
 0x735   : > { %v1612_v55 = vadd.f32 %v1593_v49, %v1590_v38 }
 0x737   : > { %v1605_v39 = vpop.xlane.xlu0 %1604 }
 0x738   : > { %v1602_v40 = vpop.xlane.xlu1 %1601 }
 0x739   : > { %v1621_v15 = vadd.f32 %v1605_v39, %v1602_v40 }
 0x73b   : > { %v1608_v29 = vpop.xlane.xlu0 %1607 }
 0x73c   : > { %v1596_v51 = vpop.xlane.xlu1 %1595  ;;  %v1622_v43 = vadd.f32 %v1621_v15, %v1608_v29 }
 0x73d   : > { %v1613_v6 = vadd.f32 %v1612_v55, %v1596_v51 }
 0x73f   : > { %v1611_v12 = vpop.xlane.xlu0 %1610 }
 0x740   : > { %v1599_v57 = vpop.xlane.xlu1 %1598  ;;  %v1623_v26 = vadd.f32 %v1622_v43, %v1611_v12 }
 0x741   : > { %v1614_v14 = vadd.f32 %v1613_v6, %v1599_v57 }
 0x742   : > { %v1624_v60 = vrot.slane %v1623_v26, 4 }
 0x743   : > { %v1615_v35 = vrot.slane %v1614_v14, 4 }
 0x744   : > { %v1625_v18 = vadd.f32 %v1624_v60, %v1623_v26  ;;  %v1662_v53 = vpop.permute.xlu1 %1661 }
 0x745   : > { %v1616_v63 = vadd.f32 %v1615_v35, %v1614_v14 }
 0x746   : > { %v1626_v41 = vrot.slane %v1625_v18, 2 }
 0x747   : > { %v1617_v17 = vrot.slane %v1616_v63, 2  ;;  %v1658_v39 = vpop.permute.xlu0 %1657 }
 0x748   : > { %v1627_v21 = vadd.f32 %v1626_v41, %v1625_v18  ;;  %v1666_v48 = vpop.permute.xlu1 %1665 }
 0x749   : > { %v1618_v50 = vadd.f32 %v1617_v17, %v1616_v63 }
 0x74a   : > { %v1628_v23 = vrot.slane %v1627_v21, 1 }
 0x74b   : > { %v1619_v27 = vrot.slane %v1618_v50, 1 }
 0x74c   : > { %v1629_v25 = vadd.f32 %v1628_v23, %v1627_v21  ;;  %v1670_v61 = vpop.permute.xlu1 %1669  ;;  %v1710_v15 = vpop.permute.xlu0 %1709 }
 0x74d   : > { %v1620_v7 = vadd.f32 %v1619_v27, %v1618_v50 }
 0x74e   : > { %v1631_v3 = vmul.f32 0.00012207031, %v1629_v25 }
 0x74f   : > { %v1630_v47 = vmul.f32 0.00012207031, %v1620_v7 }
 0x750   : > { %v1633_v9 = vadd.f32 1e-05, %v1631_v3  ;;  %v1674_v49 = vpop.permute.xlu1 %1673  ;;  %v1722_v21 = vpop.permute.xlu0 %1721 }
 0x751   : > { %v1632_v38 = vadd.f32 1e-05, %v1630_v47 }
 0x752   : > { %2193 = vrsqrt.f32 %v1633_v9 }
 0x753   : > { %2195 = vrsqrt.f32 %v1632_v38 }
 0x754   : > { %v1678_v40 = vpop.permute.xlu1 %1677 }
 0x758   : > { %v1682_v29 = vpop.permute.xlu1 %1681 }
 0x75c   : > { %v2194_v51 = vpop.eup %2193  ;;  %v1702_v55 = vpop.permute.xlu1 %1701 }
 0x75d   : > { %v2196_v43 = vpop.eup %2195  ;;  %v1644_v6 = vmul.f32 %v2194_v51, %v3051_v33  ;;  %v1645_v12 = vmul.f32 %v2194_v51, %v3054_v20  ;;  %v1646_v57 = vmul.f32 %v2194_v51, %v3045_v1  ;;  %v1647_v26 = vmul.f32 %v2194_v51, %v3048_v13 }
 0x75e   : > { %v1640_v14 = vmul.f32 %v2196_v43, %v3040_v52  ;;  %v1641_v60 = vmul.f32 %v2196_v43, %v3042_v24  ;;  %v1642_v35 = vmul.f32 %v2196_v43, %v3072_v46  ;;  %v1643_v18 = vmul.f32 %v2196_v43, %v3087_v2 }
 0x75f   : > { %v3122_v63 = vmul.f32 %v1670_v61, %v1644_v6  ;;  %v3124_v41 = vmul.f32 %v1670_v61, %v1645_v12  ;;  %v1694_v17 = vmul.f32 %v1674_v49, %v1646_v57  ;;  %v1695_v33 = vmul.f32 %v1674_v49, %v1647_v26 }
 0x760   : > { %v1688_v20 = vmul.f32 %v1662_v53, %v1640_v14  ;;  %v1689_v50 = vmul.f32 %v1662_v53, %v1641_v60  ;;  %v1690_v1 = vmul.f32 %v1666_v48, %v1642_v35  ;;  %v1691_v23 = vmul.f32 %v1666_v48, %v1643_v18  ;;  %v1706_v13 = vpop.permute.xlu1 %1705 }
 0x761   : > { %v1648_v52 = vmul.f32 %v2194_v51, %v3057_v22  ;;  %v1649_v24 = vmul.f32 %v2194_v51, %v3059_v45  ;;  %v1638_v46 = vmul.f32 %v2196_v43, %v3020_v0  ;;  %v1639_v2 = vmul.f32 %v2196_v43, %v3023_v58 }
 0x762   : > { %v1650_v27 = vmul.f32 %v2194_v51, %v3077_v62  ;;  %v1651_v25 = vmul.f32 %v2194_v51, %v3080_v44  ;;  %v1736_v61 = vadd.f32 %v1710_v15, %v1688_v20  ;;  %v1737_v7 = vadd.f32 %v1710_v15, %v1689_v50  ;;  %v1730_v44 = vpop.permute.xlu0 %1729 }
 0x763   : > { %v1696_v3 = vmul.f32 %v1678_v40, %v1648_v52  ;;  %v1697_v47 = vmul.f32 %v1678_v40, %v1649_v24  ;;  %v1686_v53 = vmul.f32 %v1658_v39, %v1638_v46  ;;  %v1687_v9 = vmul.f32 %v1658_v39, %v1639_v2 }
 0x764   : > { %v1698_v48 = vmul.f32 %v1682_v29, %v1650_v27  ;;  %v1699_v49 = vmul.f32 %v1682_v29, %v1651_v25  ;;  %v1752_v38 = vmax.f32 %v1736_v61, 0.0  ;;  %v1753_v22 = vmax.f32 %v1737_v7, 0.0  ;;  %v1714_v45 = vpop.permute.xlu1 %1713 }
 0x765   : > { %v1636_v0 = vmul.f32 %v2196_v43, %v3026_v10  ;;  %v1637_v58 = vmul.f32 %v2196_v43, %v3029_v30  ;;  %v1742_v62 = vadd.f32 %v1722_v21, %v1694_v17  ;;  %v1743_v6 = vadd.f32 %v1722_v21, %v1695_v33 }
 0x766   : > { %v1768_v15 = vadd.f32 %v1752_v38, %v2884_v4  ;;  %v1769_v40 = vadd.f32 %v1753_v22, %v2845_v32  ;;  %v1734_v51 = vadd.f32 %v1706_v13, %v1686_v53  ;;  %v1735_v39 = vadd.f32 %v1706_v13, %v1687_v9 }
 0x767   : > { %v1684_v29 = vmul.f32 %v3112_v28, %v1636_v0  ;;  %v1685_v12 = vmul.f32 %v3112_v28, %v1637_v58  ;;  %v1758_v57 = vmax.f32 %v1742_v62, 0.0  ;;  %v1759_v26 = vmax.f32 %v1743_v6, 0.0 }
 0x768   : > { %1784 = vst [vmem:[%s2509_s10 + $0x20] sm:$0xff] %v1768_v15  ;;  %1785 = vst [vmem:[%s2509_s10 + $0x28] sm:$0xff] %v1769_v40  ;;  %v1750_v10 = vmax.f32 %v1734_v51, 0.0  ;;  %v1751_v30 = vmax.f32 %v1735_v39, 0.0  ;;  %v1746_v43 = vadd.f32 %v1730_v44, %v1698_v48  ;;  %v1747_v14 = vadd.f32 %v1730_v44, %v1699_v49  ;;  %v1718_v4 = vpop.permute.xlu1 %1717 }
 0x769   : > { %v1732_v32 = vadd.f32 %v1702_v55, %v1684_v29  ;;  %v1733_v60 = vadd.f32 %v1702_v55, %v1685_v12  ;;  %v1774_v35 = vadd.f32 %v1758_v57, %v2913_v8  ;;  %v1775_v18 = vadd.f32 %v1759_v26, %v2890_v11 }
 0x76a   : > { %v1766_v28 = vadd.f32 %v1750_v10, %v2863_v59  ;;  %v1767_v17 = vadd.f32 %v1751_v30, %v2827_v56  ;;  %v1762_v33 = vmax.f32 %v1746_v43, 0.0  ;;  %v1763_v21 = vmax.f32 %v1747_v14, 0.0 }
 0x76b   : > { %v1748_v20 = vmax.f32 %v1732_v32, 0.0  ;;  %v1749_v50 = vmax.f32 %v1733_v60, 0.0  ;;  %1790 = vst [vmem:[%s2509_s10 + $0x50] sm:$0xff] %v1774_v35  ;;  %1791 = vst [vmem:[%s2509_s10 + $0x58] sm:$0xff] %v1775_v18  ;;  %v1738_v13 = vadd.f32 %v1714_v45, %v1690_v1  ;;  %v1739_v52 = vadd.f32 %v1714_v45, %v1691_v23 }
 0x76c   : > { %1782 = vst [vmem:[%s2509_s10 + $0x10] sm:$0xff] %v1766_v28  ;;  %1783 = vst [vmem:[%s2509_s10 + $0x18] sm:$0xff] %v1767_v17  ;;  %v1778_v8 = vadd.f32 %v1762_v33, %v2945_v16  ;;  %v1779_v59 = vadd.f32 %v1763_v21, %v2921_v36  ;;  %v1740_v56 = vadd.f32 %v1718_v4, %v3122_v63  ;;  %v1726_v55 = vpop.permute.xlu1 %1725 }
 0x76d   : > { %v1741_v11 = vadd.f32 %v1718_v4, %v3124_v41  ;;  %v1764_v24 = vadd.f32 %v1748_v20, %v2842_v31  ;;  %v1765_v46 = vadd.f32 %v1749_v50, %v2824_v54  ;;  %v1754_v2 = vmax.f32 %v1738_v13, 0.0 }
 0x76e   : > { %v1755_v1 = vmax.f32 %v1739_v52, 0.0  ;;  %1794 = vst [vmem:[%s2509_s10 + $0x70] sm:$0xff] %v1778_v8  ;;  %1795 = vst [vmem:[%s2509_s10 + $0x78] sm:$0xff] %v1779_v59  ;;  %v1756_v16 = vmax.f32 %v1740_v56, 0.0  ;;  %v1744_v36 = vadd.f32 %v1726_v55, %v1696_v3  ;;  %v1745_v63 = vadd.f32 %v1726_v55, %v1697_v47  ;;  %v3245_v3 = vld [vmem:[#allocation10_spill] sm:$0xff] }
 0x76f   : > { %v1757_v23 = vmax.f32 %v1741_v11, 0.0  ;;  %1780 = vst [vmem:[%s2509_s10] sm:$0xff] %v1764_v24  ;;  %1781 = vst [vmem:[%s2509_s10 + $0x8] sm:$0xff] %v1765_v46  ;;  %v1770_v31 = vadd.f32 %v1754_v2, %v2887_v5 }
 0x770   : > { %v1771_v54 = vadd.f32 %v1755_v1, %v2848_v34  ;;  %v1772_v41 = vadd.f32 %v1756_v16, %v2910_v42  ;;  %v1760_v25 = vmax.f32 %v1744_v36, 0.0  ;;  %v1761_v61 = vmax.f32 %v1745_v63, 0.0 }
 0x771   : > { %v1773_v27 = vadd.f32 %v1757_v23, %v2867_v19  ;;  %1786 = vst [vmem:[%s2509_s10 + $0x30] sm:$0xff] %v1770_v31 }
 0x772   : > { %1787 = vst [vmem:[%s2509_s10 + $0x38] sm:$0xff] %v1771_v54  ;;  %1788 = vst [vmem:[%s2509_s10 + $0x40] sm:$0xff] %v1772_v41  ;;  %v1776_v7 = vadd.f32 %v1760_v25, %v2942_v37  ;;  %v1777_v47 = vadd.f32 %v1761_v61, %v3245_v3 }
 0x773   : > { %1789 = vst [vmem:[%s2509_s10 + $0x48] sm:$0xff] %v1773_v27 }
 0x774   : > { %1792 = vst [vmem:[%s2509_s10 + $0x60] sm:$0xff] %v1776_v7  ;;  %1793 = vst [vmem:[%s2509_s10 + $0x68] sm:$0xff] %v1777_v47 }
 0x775 PF: > { %s1962_s23 = sshll.u32 %s2313_s19, 11  ;;  %s1810_s14 = sshll.u32 %s2509_s10, 4  ;;  %s3177_s14 = int_to_ptr.vmem [resolvable:$true] %s1810_s14 }
 0x776   : > { %s3174_s9 = scalar_lea.hbm %s3235_s4, %s1962_s23  ;;  %s1797_s29 = scalar_lea.sflag [#allocation6], %s2492_s11 }
 0x777   : > { %s2227_s5 = scalar_lea.vmem %s3177_s14, 2048  ;;  %p3246_p12 = scmp.ne.s32.totalorder %s3240_s30, 0 }
 0x778   : > { %p2228_p0 = scmp.ne.s32.totalorder %s3177_s14, %s2227_s5  ;;  %s2339_s28 = smov [#allocation7]  }
 0x779   : > { %s2231_s12 = sshll.u32 %s2339_s28, 4  ;;  %s2232_s12 = int_to_ptr.vmem [resolvable:$false] %s2231_s12 }
 0x77a   : > { %p2229_p13 = pnand %p2228_p0, %p3246_p12  ;;  %s2233_s19 = scalar_lea.vmem %s2232_s12, 4096 }
 0x77b   : > { %p2234_p5 = scmp.lt.s32.totalorder %s3177_s14, %s2232_s12  ;;  %p2235_p3 = scmp.lt.s32.totalorder %s2233_s19, %s2227_s5 }
 0x77c   : > { %p2230_p2 = pneg %p2229_p13 }
 0x77d   : > { %p2236_p7 = por %p2235_p3, %p2234_p5 }
 0x77f   : > { %p2237_p8 = pnand %p2236_p7, %p2230_p2 }
 0x781   : > { %2240 = shalt.err (!%p2237_p8)
}
 0x782   : > { %s2241_s10 = scalar_lea.hbm %s3174_s9, 2048  ;;  %s2245_s18 = scalar_lea.hbm %s3235_s4, 4096 }
 0x783   : > { %p2242_p1 = scmp.ne.s32.totalorder %s3174_s9, %s2241_s10  ;;  %p2246_p10 = scmp.lt.u32.totalorder %s3174_s9, %s3235_s4 }
 0x784   : > { %p2247_p11 = scmp.lt.u32.totalorder %s2245_s18, %s2241_s10  ;;  %p2249_p0 = scmp.lt.u32.totalorder %s2241_s10, %s3174_s9 }
 0x785   : > { %p2243_p4 = pnand %p2242_p1, %p3246_p12 }
 0x786   : > { %p2248_p9 = por %p2247_p11, %p2246_p10 }
 0x787   : > { %p2244_p6 = pneg %p2243_p4 }
 0x788   : > { %p2250_p13 = por %p2249_p0, %p2248_p9 }
 0x78a   : > { %p2251_p2 = pnand %p2250_p13, %p2244_p6 }
 0x78c   : > { %2254 = shalt.err (!%p2251_p2)
}
 0x78d   : > { %s2340_s27 = smov 256   ;;  %s2341_s5 = smov 16  }
 0x78e   : > { %2018 = dma.vmem_to_hbm [thread:$0]  (%p3246_p12), %s3177_s14, 2048, %s3174_s9, %s1797_s29, %s2340_s27, %s2340_s27, %s2341_s5  }
 0x78f PF: > { %p2029_p5 = scmp.ge.s32.totalorder %s2325_s22, 2  ;;  %s1825_s28 = sand.u32 1, %s2297_s15  }
 0x790   : > { %p3247_p3 = scmp.ne.s32.totalorder %s3241_s6, 0  ;;  %s1826_s12 = scalar_lea.sflag [#allocation6], %s1825_s28 }
 0x792   : > { %p2025_p7 = pnand %p2029_p5, %p3247_p3 }
 0x794   : > { %2292 = dma.done.wait (!%p2025_p7), %s1826_s12, 2048  }
 0x795   : > { %2294 = vsyncadd (!%p2025_p7), %s1826_s12, 4294965248  ;;  %s20_s22 = sadd.s32 1, %s2325_s22   ;;  %s3248_s15 = smov %s2301_s16 }
 0x796   : > { %p17_p8 = scmp.ge.s32.totalorder %s20_s22, 6   ;;  %s3249_s16 = smov %s2305_s17 }
 0x797   : > { %s3250_s17 = smov %s2443_s8  ;;  %s3251_s18 = smov %s2317_s20 }
 0x798   : > { %s3252_s19 = smov %s2321_s21  ;;  %s3253_s20 = smov %s3256_s25 }
 0x799   : > { %s3254_s21 = smov %s3260_s26  ;;  %19 = sbr.rel (!%p17_p8) target bundleno = 7 (0x7), region = 95 }
 0x7a0   :  { %1831 = vsyncpa [#allocation5], 1 }
 0x7a1   :  { %1833 = vsyncpa [#allocation5 + $0x1], 1 }
 0x7a2   :  { %1834 = vsyncpa [#allocation6], 1 }
 0x7a3   :  { %1836 = vsyncpa [#allocation6 + $0x1], 1 }

</bundles_post_ra>
